<compile_context>
chip_gen: v5e
topology: v5e:2x2
jax: 0.10.0
libtpu: 0.0.40
codegen_flags: <defaults>
</compile_context>

<pallas_src>
import functools
import math

import jax
import jax.numpy as jnp
from jax import lax
from jax.experimental import pallas as pl
from jax.experimental.pallas import tpu as pltpu


def _gat_kernel(x2d_ref, w_all_ref, a1_ref, a2_ref, bias_ref, w_out_ref,
                a_out_ref, out_ref, *, B, N, C_out, n_heads, alpha):
    x2d = x2d_ref[...]          # (B*N, C_in)
    W_all = w_all_ref[...]      # (C_in, H*C_out)   all heads' W, column-concat
    A1 = a1_ref[...]            # (H*C_out, H)      block-diagonal a1's
    A2 = a2_ref[...]            # (H*C_out, H)      block-diagonal a2's
    bias = bias_ref[...]        # (N, N)            additive adjacency mask
    W_out = w_out_ref[...]      # (H*C_out, C_out)
    a_out = a_out_ref[...]      # (2*C_out, 1)
    a1o = a_out[:C_out, :]      # (C_out, 1)
    a2o = a_out[C_out:, :]      # (C_out, 1)

    # --- all heads' feature projection: one MXU matmul over B*N rows --------
    h_all = jnp.dot(x2d, W_all, preferred_element_type=jnp.float32)   # (B*N, H*C)

    # --- all heads' attention-vector projections, fused ---------------------
    f1_all = jnp.dot(h_all, A1, preferred_element_type=jnp.float32)   # (B*N, H)
    # f2 produced already transposed: transpose folded into the MXU.
    f2t_all = lax.dot_general(A2, h_all,
                              dimension_numbers=(((0,), (1,)), ((), ())),
                              preferred_element_type=jnp.float32)     # (H, B*N)

    def masked_softmax(logits):
        # logits: (N, N); bias already encodes the adjacency mask additively.
        e = jnp.where(logits > 0, logits, alpha * logits)             # LeakyReLU
        att = e + bias
        att = att - jnp.max(att, axis=-1, keepdims=True)
        p = jnp.exp(att)
        inv = pl.reciprocal(jnp.sum(p, axis=-1, keepdims=True), approx=True)
        return p * inv

    for b in range(B):          # B, H tiny & static -> unrolled at trace time
        r0, r1 = b * N, (b + 1) * N
        # out_att's input projection accumulated across heads (no concat).
        h2 = jnp.zeros((N, C_out), jnp.float32)
        for hd in range(n_heads):
            c0, c1 = hd * C_out, (hd + 1) * C_out
            h_h = h_all[r0:r1, c0:c1]                                 # (N, C_out)
            f1 = f1_all[r0:r1, hd:hd + 1]                             # (N, 1)
            f2r = f2t_all[hd:hd + 1, r0:r1]                           # (1, N)
            attn = masked_softmax(f1 + f2r)                           # (N, N)
            head_out = jnp.maximum(                                   # ReLU (concat=True)
                jnp.dot(attn, h_h, preferred_element_type=jnp.float32), 0.0)
            h2 = h2 + jnp.dot(head_out, W_out[c0:c1, :],
                              preferred_element_type=jnp.float32)

        # ---- out_att layer (concat=False) -----------------------------------
        f1o = jnp.dot(h2, a1o, preferred_element_type=jnp.float32)    # (N, 1)
        f2or = lax.dot_general(a2o, h2,
                               dimension_numbers=(((0,), (1,)), ((), ())),
                               preferred_element_type=jnp.float32)    # (1, N)
        attn_o = masked_softmax(f1o + f2or)
        hp = jnp.dot(attn_o, h2, preferred_element_type=jnp.float32)  # (N, C_out)

        # ---- GAT epilogue: ELU then log_softmax over features ---------------
        hp = jnp.where(hp > 0, hp, jnp.exp(hp) - 1.0)                 # ELU (alpha=1)
        m = jnp.max(hp, axis=-1, keepdims=True)
        z = hp - m
        lse = jnp.log(jnp.sum(jnp.exp(z), axis=-1, keepdims=True))
        out_ref[b] = (z - lse).astype(out_ref.dtype)


def gat_forward(x, W_heads, a_heads, W_out, a_out, adj, *, alpha):
    B, N, C_in = x.shape
    n_heads, _, C_out = W_heads.shape

    # Batch-invariant preprocessing, done once in XLA (not inside the kernel):
    x2d = x.reshape(B * N, C_in)
    W_all = jnp.transpose(W_heads, (1, 0, 2)).reshape(C_in, n_heads * C_out)
    a1 = a_heads[:, :C_out, 0]                                  # (H, C_out)
    a2 = a_heads[:, C_out:, 0]                                  # (H, C_out)
    eye = jnp.eye(n_heads, dtype=x.dtype)
    A1 = (a1[:, :, None] * eye[:, None, :]).reshape(n_heads * C_out, n_heads)
    A2 = (a2[:, :, None] * eye[:, None, :]).reshape(n_heads * C_out, n_heads)
    bias = jnp.where(adj > 0, 0.0, -1.0e12).astype(jnp.float32)  # additive mask

    kernel = functools.partial(_gat_kernel, B=B, N=N, C_out=C_out,
                               n_heads=n_heads, alpha=alpha)

    return pl.pallas_call(
        kernel,
        out_shape=jax.ShapeDtypeStruct((B, N, C_out), jnp.float32),
        grid_spec=pltpu.PrefetchScalarGridSpec(
            num_scalar_prefetch=0,
            grid=(1,),   # whole problem in one step: removes per-step overhead
            in_specs=[
                pl.BlockSpec((B * N, C_in), lambda i: (0, 0)),            # x2d
                pl.BlockSpec((C_in, n_heads * C_out), lambda i: (0, 0)),  # W_all
                pl.BlockSpec((n_heads * C_out, n_heads), lambda i: (0, 0)),  # A1
                pl.BlockSpec((n_heads * C_out, n_heads), lambda i: (0, 0)),  # A2
                pl.BlockSpec((N, N), lambda i: (0, 0)),                   # bias
                pl.BlockSpec((n_heads * C_out, C_out), lambda i: (0, 0)), # W_out
                pl.BlockSpec((2 * C_out, 1), lambda i: (0, 0)),           # a_out
            ],
            out_specs=pl.BlockSpec((B, N, C_out), lambda i: (0, 0, 0)),
        ),
        compiler_params=pltpu.CompilerParams(
            dimension_semantics=("arbitrary",),
        ),
    )(x2d, W_all, A1, A2, bias, W_out, a_out)


def xavier_uniform(key, shape, gain):
    fan_in, fan_out = shape[0], shape[1]
    bound = gain * math.sqrt(6.0 / (fan_in + fan_out))
    return jax.random.uniform(key, shape, jnp.float32, minval=-bound, maxval=bound)


# ---------------- pure-JAX reference mirroring the PyTorch module ------------
def _layer_reference(x, W, a, adj, alpha, concat):
    B, N, _ = x.shape
    F_out = W.shape[1]
    h = jnp.matmul(x, W)
    hi = jnp.broadcast_to(h[:, :, None, :], (B, N, N, F_out))
    hj = jnp.broadcast_to(h[:, None, :, :], (B, N, N, F_out))
    a_input = jnp.concatenate([hi, hj], axis=-1)
    e = jnp.squeeze(jnp.matmul(a_input, a), axis=3)
    e = jnp.where(e > 0, e, alpha * e)                       # LeakyReLU
    att = jnp.where(adj[None] > 0, e, -1.0e12 * jnp.ones_like(e))
    att = jax.nn.softmax(att, axis=2)
    h_prime = jnp.matmul(att, h)
    return jax.nn.relu(h_prime) if concat else h_prime


def gat_reference(x, W_heads, a_heads, W_out, a_out, adj, *, alpha):
    n_heads = W_heads.shape[0]
    heads = [_layer_reference(x, W_heads[h], a_heads[h], adj, alpha, True)
             for h in range(n_heads)]
    xc = jnp.concatenate(heads, axis=2)
    y = _layer_reference(xc, W_out, a_out, adj, alpha, False)
    y = jnp.where(y > 0, y, jnp.exp(y) - 1.0)                # ELU (alpha=1)
    return jax.nn.log_softmax(y, axis=2)


if __name__ == "__main__":
    # Module hyperparameters (deterministic in-script init).
    in_features = 8
    out_features = 16
    n_heads = 4
    alpha = 0.2
    # dropout = 0.6   # training-mode only; forward here is eval-mode (identity)

    B, N = 2, 16

    key = jax.random.PRNGKey(0)
    keys = jax.random.split(key, 2 * n_heads + 4)

    W_heads = jnp.stack([xavier_uniform(keys[h], (in_features, out_features), 1.414)
                         for h in range(n_heads)])                      # (H, C_in, C_out)
    a_heads = jnp.stack([xavier_uniform(keys[n_heads + h], (2 * out_features, 1), 1.414)
                         for h in range(n_heads)])                      # (H, 2*C_out, 1)
    W_out = xavier_uniform(keys[2 * n_heads], (n_heads * out_features, out_features), 1.414)
    a_out = xavier_uniform(keys[2 * n_heads + 1], (2 * out_features, 1), 1.414)

    x = jax.random.normal(keys[2 * n_heads + 2], (B, N, in_features), dtype=jnp.float32)
    # Random 0/1 adjacency with self-loops so every row has a valid neighbor.
    adj = (jax.random.uniform(keys[2 * n_heads + 3], (N, N)) > 0.5).astype(jnp.float32)
    adj = jnp.maximum(adj, jnp.eye(N, dtype=jnp.float32))

    out = gat_forward(x, W_heads, a_heads, W_out, a_out, adj, alpha=alpha)
    out = jax.block_until_ready(out)

    ref = gat_reference(x, W_heads, a_heads, W_out, a_out, adj, alpha=alpha)
    assert out.shape == (B, N, out_features)
    # Tolerance covers pl.reciprocal(approx=True) in the softmax normalizations
    # (~2^-12 relative error per softmax, compounded through two attention
    # stages); with approx=False this matches to <1e-4.
    assert jnp.allclose(out, ref, atol=5e-3, rtol=5e-3), "mismatch vs reference"

    print("KERNEL_OK")
</pallas_src>

<mosaic_0001>
module attributes {stable_mosaic.version = 11 : i64} {
  func.func @_gat_kernel(%arg0: i32, %arg1: memref<32x8xf32, #tpu.memory_space<vmem>>, %arg2: memref<8x64xf32, #tpu.memory_space<vmem>>, %arg3: memref<64x4xf32, #tpu.memory_space<vmem>>, %arg4: memref<64x4xf32, #tpu.memory_space<vmem>>, %arg5: memref<16x16xf32, #tpu.memory_space<vmem>>, %arg6: memref<64x16xf32, #tpu.memory_space<vmem>>, %arg7: memref<32x1xf32, #tpu.memory_space<vmem>>, %arg8: memref<2x16x16xf32, #tpu.memory_space<vmem>>) attributes {dimension_semantics = [#tpu.dimension_semantics<arbitrary>], iteration_bounds = array<i64: 1>, scalar_prefetch = 0 : i64, scratch_operands = 0 : i64, tpu.core_type = #tpu.core_type<tc>, window_params = [{pipeline_mode = #tpu.pipeline_mode<synchronous>, transform_indices = @transform_0, window_bounds = array<i64: 32, 8>}, {pipeline_mode = #tpu.pipeline_mode<synchronous>, transform_indices = @transform_1, window_bounds = array<i64: 8, 64>}, {pipeline_mode = #tpu.pipeline_mode<synchronous>, transform_indices = @transform_2, window_bounds = array<i64: 64, 4>}, {pipeline_mode = #tpu.pipeline_mode<synchronous>, transform_indices = @transform_3, window_bounds = array<i64: 64, 4>}, {pipeline_mode = #tpu.pipeline_mode<synchronous>, transform_indices = @transform_4, window_bounds = array<i64: 16, 16>}, {pipeline_mode = #tpu.pipeline_mode<synchronous>, transform_indices = @transform_5, window_bounds = array<i64: 64, 16>}, {pipeline_mode = #tpu.pipeline_mode<synchronous>, transform_indices = @transform_6, window_bounds = array<i64: 32, 1>}, {pipeline_mode = #tpu.pipeline_mode<synchronous>, transform_indices = @transform_7, window_bounds = array<i64: 2, 16, 16>}]} {
    %c0 = arith.constant 0 : index
    %c0_0 = arith.constant 0 : index
    %0 = vector.load %arg1[%c0, %c0_0] : memref<32x8xf32, #tpu.memory_space<vmem>>, vector<32x8xf32>
    %c0_1 = arith.constant 0 : index
    %c0_2 = arith.constant 0 : index
    %1 = vector.load %arg2[%c0_1, %c0_2] : memref<8x64xf32, #tpu.memory_space<vmem>>, vector<8x64xf32>
    %c0_3 = arith.constant 0 : index
    %c0_4 = arith.constant 0 : index
    %2 = vector.load %arg3[%c0_3, %c0_4] : memref<64x4xf32, #tpu.memory_space<vmem>>, vector<64x4xf32>
    %c0_5 = arith.constant 0 : index
    %c0_6 = arith.constant 0 : index
    %3 = vector.load %arg4[%c0_5, %c0_6] : memref<64x4xf32, #tpu.memory_space<vmem>>, vector<64x4xf32>
    %c0_7 = arith.constant 0 : index
    %c0_8 = arith.constant 0 : index
    %4 = vector.load %arg5[%c0_7, %c0_8] : memref<16x16xf32, #tpu.memory_space<vmem>>, vector<16x16xf32>
    %c0_9 = arith.constant 0 : index
    %c0_10 = arith.constant 0 : index
    %5 = vector.load %arg6[%c0_9, %c0_10] : memref<64x16xf32, #tpu.memory_space<vmem>>, vector<64x16xf32>
    %c0_11 = arith.constant 0 : index
    %c0_12 = arith.constant 0 : index
    %6 = vector.load %arg7[%c0_11, %c0_12] : memref<32x1xf32, #tpu.memory_space<vmem>>, vector<32x1xf32>
    %7 = vector.extract_strided_slice %6 {offsets = [0, 0], sizes = [16, 1], strides = [1, 1]} : vector<32x1xf32> to vector<16x1xf32>
    %8 = vector.extract_strided_slice %6 {offsets = [16, 0], sizes = [16, 1], strides = [1, 1]} : vector<32x1xf32> to vector<16x1xf32>
    %cst = arith.constant dense<0.000000e+00> : vector<32x64xf32>
    %9 = tpu.matmul %0, %1, %cst {dimension_numbers = #tpu.dot_dimension_numbers<[1], [0], [0], [1], [0, 0, 1, 1], [], []>} : vector<32x8xf32>, vector<8x64xf32>, vector<32x64xf32> -> vector<32x64xf32>
    %cst_13 = arith.constant dense<0.000000e+00> : vector<32x4xf32>
    %10 = tpu.matmul %9, %2, %cst_13 {dimension_numbers = #tpu.dot_dimension_numbers<[1], [0], [0], [1], [0, 0, 1, 1], [], []>} : vector<32x64xf32>, vector<64x4xf32>, vector<32x4xf32> -> vector<32x4xf32>
    %cst_14 = arith.constant dense<0.000000e+00> : vector<4x32xf32>
    %11 = tpu.matmul %3, %9, %cst_14 {dimension_numbers = #tpu.dot_dimension_numbers<[0], [1], [1], [0], [0, 1, 1, 0], [], []>} : vector<64x4xf32>, vector<32x64xf32>, vector<4x32xf32> -> vector<4x32xf32>
    %cst_15 = arith.constant 0.000000e+00 : f32
    %12 = vector.broadcast %cst_15 : f32 to vector<16x16xf32>
    %13 = vector.extract_strided_slice %9 {offsets = [0, 0], sizes = [16, 16], strides = [1, 1]} : vector<32x64xf32> to vector<16x16xf32>
    %14 = vector.extract_strided_slice %10 {offsets = [0, 0], sizes = [16, 1], strides = [1, 1]} : vector<32x4xf32> to vector<16x1xf32>
    %15 = vector.extract_strided_slice %11 {offsets = [0, 0], sizes = [1, 16], strides = [1, 1]} : vector<4x32xf32> to vector<1x16xf32>
    %16 = vector.broadcast %14 : vector<16x1xf32> to vector<16x16xf32>
    %17 = vector.broadcast %15 : vector<1x16xf32> to vector<16x16xf32>
    %18 = arith.addf %16, %17 : vector<16x16xf32>
    %cst_16 = arith.constant 0.000000e+00 : f32
    %19 = vector.broadcast %cst_16 : f32 to vector<16x16xf32>
    %20 = arith.cmpf ogt, %18, %19 : vector<16x16xf32>
    %cst_17 = arith.constant 2.000000e-01 : f32
    %21 = vector.broadcast %cst_17 : f32 to vector<16x16xf32>
    %22 = arith.mulf %21, %18 : vector<16x16xf32>
    %23 = arith.select %20, %18, %22 : vector<16x16xi1>, vector<16x16xf32>
    %24 = arith.addf %23, %4 : vector<16x16xf32>
    %cst_18 = arith.constant dense<0xFF800000> : vector<16xf32>
    %25 = vector.multi_reduction <maximumf>, %24, %cst_18 [1] : vector<16x16xf32> to vector<16xf32>
    %26 = vector.shape_cast %25 : vector<16xf32> to vector<16x1xf32>
    %27 = vector.broadcast %26 : vector<16x1xf32> to vector<16x16xf32>
    %28 = arith.subf %24, %27 : vector<16x16xf32>
    %29 = math.exp %28 : vector<16x16xf32>
    %cst_19 = arith.constant dense<0.000000e+00> : vector<16xf32>
    %30 = vector.multi_reduction <add>, %29, %cst_19 [1] : vector<16x16xf32> to vector<16xf32>
    %31 = vector.shape_cast %30 : vector<16xf32> to vector<16x1xf32>
    %32 = tpu.reciprocal %31 {approx = true} : vector<16x1xf32> -> vector<16x1xf32>
    %33 = vector.broadcast %32 : vector<16x1xf32> to vector<16x16xf32>
    %34 = arith.mulf %29, %33 : vector<16x16xf32>
    %cst_20 = arith.constant dense<0.000000e+00> : vector<16x16xf32>
    %35 = tpu.matmul %34, %13, %cst_20 {dimension_numbers = #tpu.dot_dimension_numbers<[1], [0], [0], [1], [0, 0, 1, 1], [], []>} : vector<16x16xf32>, vector<16x16xf32>, vector<16x16xf32> -> vector<16x16xf32>
    %cst_21 = arith.constant 0.000000e+00 : f32
    %36 = vector.broadcast %cst_21 : f32 to vector<16x16xf32>
    %37 = arith.maximumf %35, %36 : vector<16x16xf32>
    %38 = vector.extract_strided_slice %5 {offsets = [0, 0], sizes = [16, 16], strides = [1, 1]} : vector<64x16xf32> to vector<16x16xf32>
    %cst_22 = arith.constant dense<0.000000e+00> : vector<16x16xf32>
    %39 = tpu.matmul %37, %38, %cst_22 {dimension_numbers = #tpu.dot_dimension_numbers<[1], [0], [0], [1], [0, 0, 1, 1], [], []>} : vector<16x16xf32>, vector<16x16xf32>, vector<16x16xf32> -> vector<16x16xf32>
    %40 = arith.addf %12, %39 : vector<16x16xf32>
    %41 = vector.extract_strided_slice %9 {offsets = [0, 16], sizes = [16, 16], strides = [1, 1]} : vector<32x64xf32> to vector<16x16xf32>
    %42 = vector.extract_strided_slice %10 {offsets = [0, 1], sizes = [16, 1], strides = [1, 1]} : vector<32x4xf32> to vector<16x1xf32>
    %43 = vector.extract_strided_slice %11 {offsets = [1, 0], sizes = [1, 16], strides = [1, 1]} : vector<4x32xf32> to vector<1x16xf32>
    %44 = vector.broadcast %42 : vector<16x1xf32> to vector<16x16xf32>
    %45 = vector.broadcast %43 : vector<1x16xf32> to vector<16x16xf32>
    %46 = arith.addf %44, %45 : vector<16x16xf32>
    %cst_23 = arith.constant 0.000000e+00 : f32
    %47 = vector.broadcast %cst_23 : f32 to vector<16x16xf32>
    %48 = arith.cmpf ogt, %46, %47 : vector<16x16xf32>
    %cst_24 = arith.constant 2.000000e-01 : f32
    %49 = vector.broadcast %cst_24 : f32 to vector<16x16xf32>
    %50 = arith.mulf %49, %46 : vector<16x16xf32>
    %51 = arith.select %48, %46, %50 : vector<16x16xi1>, vector<16x16xf32>
    %52 = arith.addf %51, %4 : vector<16x16xf32>
    %cst_25 = arith.constant dense<0xFF800000> : vector<16xf32>
    %53 = vector.multi_reduction <maximumf>, %52, %cst_25 [1] : vector<16x16xf32> to vector<16xf32>
    %54 = vector.shape_cast %53 : vector<16xf32> to vector<16x1xf32>
    %55 = vector.broadcast %54 : vector<16x1xf32> to vector<16x16xf32>
    %56 = arith.subf %52, %55 : vector<16x16xf32>
    %57 = math.exp %56 : vector<16x16xf32>
    %cst_26 = arith.constant dense<0.000000e+00> : vector<16xf32>
    %58 = vector.multi_reduction <add>, %57, %cst_26 [1] : vector<16x16xf32> to vector<16xf32>
    %59 = vector.shape_cast %58 : vector<16xf32> to vector<16x1xf32>
    %60 = tpu.reciprocal %59 {approx = true} : vector<16x1xf32> -> vector<16x1xf32>
    %61 = vector.broadcast %60 : vector<16x1xf32> to vector<16x16xf32>
    %62 = arith.mulf %57, %61 : vector<16x16xf32>
    %cst_27 = arith.constant dense<0.000000e+00> : vector<16x16xf32>
    %63 = tpu.matmul %62, %41, %cst_27 {dimension_numbers = #tpu.dot_dimension_numbers<[1], [0], [0], [1], [0, 0, 1, 1], [], []>} : vector<16x16xf32>, vector<16x16xf32>, vector<16x16xf32> -> vector<16x16xf32>
    %cst_28 = arith.constant 0.000000e+00 : f32
    %64 = vector.broadcast %cst_28 : f32 to vector<16x16xf32>
    %65 = arith.maximumf %63, %64 : vector<16x16xf32>
    %66 = vector.extract_strided_slice %5 {offsets = [16, 0], sizes = [16, 16], strides = [1, 1]} : vector<64x16xf32> to vector<16x16xf32>
    %cst_29 = arith.constant dense<0.000000e+00> : vector<16x16xf32>
    %67 = tpu.matmul %65, %66, %cst_29 {dimension_numbers = #tpu.dot_dimension_numbers<[1], [0], [0], [1], [0, 0, 1, 1], [], []>} : vector<16x16xf32>, vector<16x16xf32>, vector<16x16xf32> -> vector<16x16xf32>
    %68 = arith.addf %40, %67 : vector<16x16xf32>
    %69 = vector.extract_strided_slice %9 {offsets = [0, 32], sizes = [16, 16], strides = [1, 1]} : vector<32x64xf32> to vector<16x16xf32>
    %70 = vector.extract_strided_slice %10 {offsets = [0, 2], sizes = [16, 1], strides = [1, 1]} : vector<32x4xf32> to vector<16x1xf32>
    %71 = vector.extract_strided_slice %11 {offsets = [2, 0], sizes = [1, 16], strides = [1, 1]} : vector<4x32xf32> to vector<1x16xf32>
    %72 = vector.broadcast %70 : vector<16x1xf32> to vector<16x16xf32>
    %73 = vector.broadcast %71 : vector<1x16xf32> to vector<16x16xf32>
    %74 = arith.addf %72, %73 : vector<16x16xf32>
    %cst_30 = arith.constant 0.000000e+00 : f32
    %75 = vector.broadcast %cst_30 : f32 to vector<16x16xf32>
    %76 = arith.cmpf ogt, %74, %75 : vector<16x16xf32>
    %cst_31 = arith.constant 2.000000e-01 : f32
    %77 = vector.broadcast %cst_31 : f32 to vector<16x16xf32>
    %78 = arith.mulf %77, %74 : vector<16x16xf32>
    %79 = arith.select %76, %74, %78 : vector<16x16xi1>, vector<16x16xf32>
    %80 = arith.addf %79, %4 : vector<16x16xf32>
    %cst_32 = arith.constant dense<0xFF800000> : vector<16xf32>
    %81 = vector.multi_reduction <maximumf>, %80, %cst_32 [1] : vector<16x16xf32> to vector<16xf32>
    %82 = vector.shape_cast %81 : vector<16xf32> to vector<16x1xf32>
    %83 = vector.broadcast %82 : vector<16x1xf32> to vector<16x16xf32>
    %84 = arith.subf %80, %83 : vector<16x16xf32>
    %85 = math.exp %84 : vector<16x16xf32>
    %cst_33 = arith.constant dense<0.000000e+00> : vector<16xf32>
    %86 = vector.multi_reduction <add>, %85, %cst_33 [1] : vector<16x16xf32> to vector<16xf32>
    %87 = vector.shape_cast %86 : vector<16xf32> to vector<16x1xf32>
    %88 = tpu.reciprocal %87 {approx = true} : vector<16x1xf32> -> vector<16x1xf32>
    %89 = vector.broadcast %88 : vector<16x1xf32> to vector<16x16xf32>
    %90 = arith.mulf %85, %89 : vector<16x16xf32>
    %cst_34 = arith.constant dense<0.000000e+00> : vector<16x16xf32>
    %91 = tpu.matmul %90, %69, %cst_34 {dimension_numbers = #tpu.dot_dimension_numbers<[1], [0], [0], [1], [0, 0, 1, 1], [], []>} : vector<16x16xf32>, vector<16x16xf32>, vector<16x16xf32> -> vector<16x16xf32>
    %cst_35 = arith.constant 0.000000e+00 : f32
    %92 = vector.broadcast %cst_35 : f32 to vector<16x16xf32>
    %93 = arith.maximumf %91, %92 : vector<16x16xf32>
    %94 = vector.extract_strided_slice %5 {offsets = [32, 0], sizes = [16, 16], strides = [1, 1]} : vector<64x16xf32> to vector<16x16xf32>
    %cst_36 = arith.constant dense<0.000000e+00> : vector<16x16xf32>
    %95 = tpu.matmul %93, %94, %cst_36 {dimension_numbers = #tpu.dot_dimension_numbers<[1], [0], [0], [1], [0, 0, 1, 1], [], []>} : vector<16x16xf32>, vector<16x16xf32>, vector<16x16xf32> -> vector<16x16xf32>
    %96 = arith.addf %68, %95 : vector<16x16xf32>
    %97 = vector.extract_strided_slice %9 {offsets = [0, 48], sizes = [16, 16], strides = [1, 1]} : vector<32x64xf32> to vector<16x16xf32>
    %98 = vector.extract_strided_slice %10 {offsets = [0, 3], sizes = [16, 1], strides = [1, 1]} : vector<32x4xf32> to vector<16x1xf32>
    %99 = vector.extract_strided_slice %11 {offsets = [3, 0], sizes = [1, 16], strides = [1, 1]} : vector<4x32xf32> to vector<1x16xf32>
    %100 = vector.broadcast %98 : vector<16x1xf32> to vector<16x16xf32>
    %101 = vector.broadcast %99 : vector<1x16xf32> to vector<16x16xf32>
    %102 = arith.addf %100, %101 : vector<16x16xf32>
    %cst_37 = arith.constant 0.000000e+00 : f32
    %103 = vector.broadcast %cst_37 : f32 to vector<16x16xf32>
    %104 = arith.cmpf ogt, %102, %103 : vector<16x16xf32>
    %cst_38 = arith.constant 2.000000e-01 : f32
    %105 = vector.broadcast %cst_38 : f32 to vector<16x16xf32>
    %106 = arith.mulf %105, %102 : vector<16x16xf32>
    %107 = arith.select %104, %102, %106 : vector<16x16xi1>, vector<16x16xf32>
    %108 = arith.addf %107, %4 : vector<16x16xf32>
    %cst_39 = arith.constant dense<0xFF800000> : vector<16xf32>
    %109 = vector.multi_reduction <maximumf>, %108, %cst_39 [1] : vector<16x16xf32> to vector<16xf32>
    %110 = vector.shape_cast %109 : vector<16xf32> to vector<16x1xf32>
    %111 = vector.broadcast %110 : vector<16x1xf32> to vector<16x16xf32>
    %112 = arith.subf %108, %111 : vector<16x16xf32>
    %113 = math.exp %112 : vector<16x16xf32>
    %cst_40 = arith.constant dense<0.000000e+00> : vector<16xf32>
    %114 = vector.multi_reduction <add>, %113, %cst_40 [1] : vector<16x16xf32> to vector<16xf32>
    %115 = vector.shape_cast %114 : vector<16xf32> to vector<16x1xf32>
    %116 = tpu.reciprocal %115 {approx = true} : vector<16x1xf32> -> vector<16x1xf32>
    %117 = vector.broadcast %116 : vector<16x1xf32> to vector<16x16xf32>
    %118 = arith.mulf %113, %117 : vector<16x16xf32>
    %cst_41 = arith.constant dense<0.000000e+00> : vector<16x16xf32>
    %119 = tpu.matmul %118, %97, %cst_41 {dimension_numbers = #tpu.dot_dimension_numbers<[1], [0], [0], [1], [0, 0, 1, 1], [], []>} : vector<16x16xf32>, vector<16x16xf32>, vector<16x16xf32> -> vector<16x16xf32>
    %cst_42 = arith.constant 0.000000e+00 : f32
    %120 = vector.broadcast %cst_42 : f32 to vector<16x16xf32>
    %121 = arith.maximumf %119, %120 : vector<16x16xf32>
    %122 = vector.extract_strided_slice %5 {offsets = [48, 0], sizes = [16, 16], strides = [1, 1]} : vector<64x16xf32> to vector<16x16xf32>
    %cst_43 = arith.constant dense<0.000000e+00> : vector<16x16xf32>
    %123 = tpu.matmul %121, %122, %cst_43 {dimension_numbers = #tpu.dot_dimension_numbers<[1], [0], [0], [1], [0, 0, 1, 1], [], []>} : vector<16x16xf32>, vector<16x16xf32>, vector<16x16xf32> -> vector<16x16xf32>
    %124 = arith.addf %96, %123 : vector<16x16xf32>
    %cst_44 = arith.constant dense<0.000000e+00> : vector<16x1xf32>
    %125 = tpu.matmul %124, %7, %cst_44 {dimension_numbers = #tpu.dot_dimension_numbers<[1], [0], [0], [1], [0, 0, 1, 1], [], []>} : vector<16x16xf32>, vector<16x1xf32>, vector<16x1xf32> -> vector<16x1xf32>
    %cst_45 = arith.constant dense<0.000000e+00> : vector<1x16xf32>
    %126 = tpu.matmul %8, %124, %cst_45 {dimension_numbers = #tpu.dot_dimension_numbers<[0], [1], [1], [0], [0, 1, 1, 0], [], []>} : vector<16x1xf32>, vector<16x16xf32>, vector<1x16xf32> -> vector<1x16xf32>
    %127 = vector.broadcast %125 : vector<16x1xf32> to vector<16x16xf32>
    %128 = vector.broadcast %126 : vector<1x16xf32> to vector<16x16xf32>
    %129 = arith.addf %127, %128 : vector<16x16xf32>
    %cst_46 = arith.constant 0.000000e+00 : f32
    %130 = vector.broadcast %cst_46 : f32 to vector<16x16xf32>
    %131 = arith.cmpf ogt, %129, %130 : vector<16x16xf32>
    %cst_47 = arith.constant 2.000000e-01 : f32
    %132 = vector.broadcast %cst_47 : f32 to vector<16x16xf32>
    %133 = arith.mulf %132, %129 : vector<16x16xf32>
    %134 = arith.select %131, %129, %133 : vector<16x16xi1>, vector<16x16xf32>
    %135 = arith.addf %134, %4 : vector<16x16xf32>
    %cst_48 = arith.constant dense<0xFF800000> : vector<16xf32>
    %136 = vector.multi_reduction <maximumf>, %135, %cst_48 [1] : vector<16x16xf32> to vector<16xf32>
    %137 = vector.shape_cast %136 : vector<16xf32> to vector<16x1xf32>
    %138 = vector.broadcast %137 : vector<16x1xf32> to vector<16x16xf32>
    %139 = arith.subf %135, %138 : vector<16x16xf32>
    %140 = math.exp %139 : vector<16x16xf32>
    %cst_49 = arith.constant dense<0.000000e+00> : vector<16xf32>
    %141 = vector.multi_reduction <add>, %140, %cst_49 [1] : vector<16x16xf32> to vector<16xf32>
    %142 = vector.shape_cast %141 : vector<16xf32> to vector<16x1xf32>
    %143 = tpu.reciprocal %142 {approx = true} : vector<16x1xf32> -> vector<16x1xf32>
    %144 = vector.broadcast %143 : vector<16x1xf32> to vector<16x16xf32>
    %145 = arith.mulf %140, %144 : vector<16x16xf32>
    %cst_50 = arith.constant dense<0.000000e+00> : vector<16x16xf32>
    %146 = tpu.matmul %145, %124, %cst_50 {dimension_numbers = #tpu.dot_dimension_numbers<[1], [0], [0], [1], [0, 0, 1, 1], [], []>} : vector<16x16xf32>, vector<16x16xf32>, vector<16x16xf32> -> vector<16x16xf32>
    %cst_51 = arith.constant 0.000000e+00 : f32
    %147 = vector.broadcast %cst_51 : f32 to vector<16x16xf32>
    %148 = arith.cmpf ogt, %146, %147 : vector<16x16xf32>
    %149 = math.exp %146 : vector<16x16xf32>
    %cst_52 = arith.constant 1.000000e+00 : f32
    %150 = vector.broadcast %cst_52 : f32 to vector<16x16xf32>
    %151 = arith.subf %149, %150 : vector<16x16xf32>
    %152 = arith.select %148, %146, %151 : vector<16x16xi1>, vector<16x16xf32>
    %cst_53 = arith.constant dense<0xFF800000> : vector<16xf32>
    %153 = vector.multi_reduction <maximumf>, %152, %cst_53 [1] : vector<16x16xf32> to vector<16xf32>
    %154 = vector.shape_cast %153 : vector<16xf32> to vector<16x1xf32>
    %155 = vector.broadcast %154 : vector<16x1xf32> to vector<16x16xf32>
    %156 = arith.subf %152, %155 : vector<16x16xf32>
    %157 = math.exp %156 : vector<16x16xf32>
    %cst_54 = arith.constant dense<0.000000e+00> : vector<16xf32>
    %158 = vector.multi_reduction <add>, %157, %cst_54 [1] : vector<16x16xf32> to vector<16xf32>
    %159 = vector.shape_cast %158 : vector<16xf32> to vector<16x1xf32>
    %160 = math.log %159 : vector<16x1xf32>
    %161 = vector.broadcast %160 : vector<16x1xf32> to vector<16x16xf32>
    %162 = arith.subf %156, %161 : vector<16x16xf32>
    %c0_55 = arith.constant 0 : index
    %c0_56 = arith.constant 0 : index
    %c0_57 = arith.constant 0 : index
    %163 = vector.load %arg8[%c0_55, %c0_56, %c0_57] : memref<2x16x16xf32, #tpu.memory_space<vmem>>, vector<1x16x16xf32>
    %164 = vector.shape_cast %163 : vector<1x16x16xf32> to vector<16x16xf32>
    %165 = vector.shape_cast %162 : vector<16x16xf32> to vector<1x16x16xf32>
    tpu.vector_store %arg8[%c0_55, %c0_56, %c0_57], %165 {strides = array<i32>} : memref<2x16x16xf32, #tpu.memory_space<vmem>>, vector<1x16x16xf32>,
    %cst_58 = arith.constant 0.000000e+00 : f32
    %166 = vector.broadcast %cst_58 : f32 to vector<16x16xf32>
    %167 = vector.extract_strided_slice %9 {offsets = [16, 0], sizes = [16, 16], strides = [1, 1]} : vector<32x64xf32> to vector<16x16xf32>
    %168 = vector.extract_strided_slice %10 {offsets = [16, 0], sizes = [16, 1], strides = [1, 1]} : vector<32x4xf32> to vector<16x1xf32>
    %169 = vector.extract_strided_slice %11 {offsets = [0, 16], sizes = [1, 16], strides = [1, 1]} : vector<4x32xf32> to vector<1x16xf32>
    %170 = vector.broadcast %168 : vector<16x1xf32> to vector<16x16xf32>
    %171 = vector.broadcast %169 : vector<1x16xf32> to vector<16x16xf32>
    %172 = arith.addf %170, %171 : vector<16x16xf32>
    %cst_59 = arith.constant 0.000000e+00 : f32
    %173 = vector.broadcast %cst_59 : f32 to vector<16x16xf32>
    %174 = arith.cmpf ogt, %172, %173 : vector<16x16xf32>
    %cst_60 = arith.constant 2.000000e-01 : f32
    %175 = vector.broadcast %cst_60 : f32 to vector<16x16xf32>
    %176 = arith.mulf %175, %172 : vector<16x16xf32>
    %177 = arith.select %174, %172, %176 : vector<16x16xi1>, vector<16x16xf32>
    %178 = arith.addf %177, %4 : vector<16x16xf32>
    %cst_61 = arith.constant dense<0xFF800000> : vector<16xf32>
    %179 = vector.multi_reduction <maximumf>, %178, %cst_61 [1] : vector<16x16xf32> to vector<16xf32>
    %180 = vector.shape_cast %179 : vector<16xf32> to vector<16x1xf32>
    %181 = vector.broadcast %180 : vector<16x1xf32> to vector<16x16xf32>
    %182 = arith.subf %178, %181 : vector<16x16xf32>
    %183 = math.exp %182 : vector<16x16xf32>
    %cst_62 = arith.constant dense<0.000000e+00> : vector<16xf32>
    %184 = vector.multi_reduction <add>, %183, %cst_62 [1] : vector<16x16xf32> to vector<16xf32>
    %185 = vector.shape_cast %184 : vector<16xf32> to vector<16x1xf32>
    %186 = tpu.reciprocal %185 {approx = true} : vector<16x1xf32> -> vector<16x1xf32>
    %187 = vector.broadcast %186 : vector<16x1xf32> to vector<16x16xf32>
    %188 = arith.mulf %183, %187 : vector<16x16xf32>
    %cst_63 = arith.constant dense<0.000000e+00> : vector<16x16xf32>
    %189 = tpu.matmul %188, %167, %cst_63 {dimension_numbers = #tpu.dot_dimension_numbers<[1], [0], [0], [1], [0, 0, 1, 1], [], []>} : vector<16x16xf32>, vector<16x16xf32>, vector<16x16xf32> -> vector<16x16xf32>
    %cst_64 = arith.constant 0.000000e+00 : f32
    %190 = vector.broadcast %cst_64 : f32 to vector<16x16xf32>
    %191 = arith.maximumf %189, %190 : vector<16x16xf32>
    %192 = vector.extract_strided_slice %5 {offsets = [0, 0], sizes = [16, 16], strides = [1, 1]} : vector<64x16xf32> to vector<16x16xf32>
    %cst_65 = arith.constant dense<0.000000e+00> : vector<16x16xf32>
    %193 = tpu.matmul %191, %192, %cst_65 {dimension_numbers = #tpu.dot_dimension_numbers<[1], [0], [0], [1], [0, 0, 1, 1], [], []>} : vector<16x16xf32>, vector<16x16xf32>, vector<16x16xf32> -> vector<16x16xf32>
    %194 = arith.addf %166, %193 : vector<16x16xf32>
    %195 = vector.extract_strided_slice %9 {offsets = [16, 16], sizes = [16, 16], strides = [1, 1]} : vector<32x64xf32> to vector<16x16xf32>
    %196 = vector.extract_strided_slice %10 {offsets = [16, 1], sizes = [16, 1], strides = [1, 1]} : vector<32x4xf32> to vector<16x1xf32>
    %197 = vector.extract_strided_slice %11 {offsets = [1, 16], sizes = [1, 16], strides = [1, 1]} : vector<4x32xf32> to vector<1x16xf32>
    %198 = vector.broadcast %196 : vector<16x1xf32> to vector<16x16xf32>
    %199 = vector.broadcast %197 : vector<1x16xf32> to vector<16x16xf32>
    %200 = arith.addf %198, %199 : vector<16x16xf32>
    %cst_66 = arith.constant 0.000000e+00 : f32
    %201 = vector.broadcast %cst_66 : f32 to vector<16x16xf32>
    %202 = arith.cmpf ogt, %200, %201 : vector<16x16xf32>
    %cst_67 = arith.constant 2.000000e-01 : f32
    %203 = vector.broadcast %cst_67 : f32 to vector<16x16xf32>
    %204 = arith.mulf %203, %200 : vector<16x16xf32>
    %205 = arith.select %202, %200, %204 : vector<16x16xi1>, vector<16x16xf32>
    %206 = arith.addf %205, %4 : vector<16x16xf32>
    %cst_68 = arith.constant dense<0xFF800000> : vector<16xf32>
    %207 = vector.multi_reduction <maximumf>, %206, %cst_68 [1] : vector<16x16xf32> to vector<16xf32>
    %208 = vector.shape_cast %207 : vector<16xf32> to vector<16x1xf32>
    %209 = vector.broadcast %208 : vector<16x1xf32> to vector<16x16xf32>
    %210 = arith.subf %206, %209 : vector<16x16xf32>
    %211 = math.exp %210 : vector<16x16xf32>
    %cst_69 = arith.constant dense<0.000000e+00> : vector<16xf32>
    %212 = vector.multi_reduction <add>, %211, %cst_69 [1] : vector<16x16xf32> to vector<16xf32>
    %213 = vector.shape_cast %212 : vector<16xf32> to vector<16x1xf32>
    %214 = tpu.reciprocal %213 {approx = true} : vector<16x1xf32> -> vector<16x1xf32>
    %215 = vector.broadcast %214 : vector<16x1xf32> to vector<16x16xf32>
    %216 = arith.mulf %211, %215 : vector<16x16xf32>
    %cst_70 = arith.constant dense<0.000000e+00> : vector<16x16xf32>
    %217 = tpu.matmul %216, %195, %cst_70 {dimension_numbers = #tpu.dot_dimension_numbers<[1], [0], [0], [1], [0, 0, 1, 1], [], []>} : vector<16x16xf32>, vector<16x16xf32>, vector<16x16xf32> -> vector<16x16xf32>
    %cst_71 = arith.constant 0.000000e+00 : f32
    %218 = vector.broadcast %cst_71 : f32 to vector<16x16xf32>
    %219 = arith.maximumf %217, %218 : vector<16x16xf32>
    %220 = vector.extract_strided_slice %5 {offsets = [16, 0], sizes = [16, 16], strides = [1, 1]} : vector<64x16xf32> to vector<16x16xf32>
    %cst_72 = arith.constant dense<0.000000e+00> : vector<16x16xf32>
    %221 = tpu.matmul %219, %220, %cst_72 {dimension_numbers = #tpu.dot_dimension_numbers<[1], [0], [0], [1], [0, 0, 1, 1], [], []>} : vector<16x16xf32>, vector<16x16xf32>, vector<16x16xf32> -> vector<16x16xf32>
    %222 = arith.addf %194, %221 : vector<16x16xf32>
    %223 = vector.extract_strided_slice %9 {offsets = [16, 32], sizes = [16, 16], strides = [1, 1]} : vector<32x64xf32> to vector<16x16xf32>
    %224 = vector.extract_strided_slice %10 {offsets = [16, 2], sizes = [16, 1], strides = [1, 1]} : vector<32x4xf32> to vector<16x1xf32>
    %225 = vector.extract_strided_slice %11 {offsets = [2, 16], sizes = [1, 16], strides = [1, 1]} : vector<4x32xf32> to vector<1x16xf32>
    %226 = vector.broadcast %224 : vector<16x1xf32> to vector<16x16xf32>
    %227 = vector.broadcast %225 : vector<1x16xf32> to vector<16x16xf32>
    %228 = arith.addf %226, %227 : vector<16x16xf32>
    %cst_73 = arith.constant 0.000000e+00 : f32
    %229 = vector.broadcast %cst_73 : f32 to vector<16x16xf32>
    %230 = arith.cmpf ogt, %228, %229 : vector<16x16xf32>
    %cst_74 = arith.constant 2.000000e-01 : f32
    %231 = vector.broadcast %cst_74 : f32 to vector<16x16xf32>
    %232 = arith.mulf %231, %228 : vector<16x16xf32>
    %233 = arith.select %230, %228, %232 : vector<16x16xi1>, vector<16x16xf32>
    %234 = arith.addf %233, %4 : vector<16x16xf32>
    %cst_75 = arith.constant dense<0xFF800000> : vector<16xf32>
    %235 = vector.multi_reduction <maximumf>, %234, %cst_75 [1] : vector<16x16xf32> to vector<16xf32>
    %236 = vector.shape_cast %235 : vector<16xf32> to vector<16x1xf32>
    %237 = vector.broadcast %236 : vector<16x1xf32> to vector<16x16xf32>
    %238 = arith.subf %234, %237 : vector<16x16xf32>
    %239 = math.exp %238 : vector<16x16xf32>
    %cst_76 = arith.constant dense<0.000000e+00> : vector<16xf32>
    %240 = vector.multi_reduction <add>, %239, %cst_76 [1] : vector<16x16xf32> to vector<16xf32>
    %241 = vector.shape_cast %240 : vector<16xf32> to vector<16x1xf32>
    %242 = tpu.reciprocal %241 {approx = true} : vector<16x1xf32> -> vector<16x1xf32>
    %243 = vector.broadcast %242 : vector<16x1xf32> to vector<16x16xf32>
    %244 = arith.mulf %239, %243 : vector<16x16xf32>
    %cst_77 = arith.constant dense<0.000000e+00> : vector<16x16xf32>
    %245 = tpu.matmul %244, %223, %cst_77 {dimension_numbers = #tpu.dot_dimension_numbers<[1], [0], [0], [1], [0, 0, 1, 1], [], []>} : vector<16x16xf32>, vector<16x16xf32>, vector<16x16xf32> -> vector<16x16xf32>
    %cst_78 = arith.constant 0.000000e+00 : f32
    %246 = vector.broadcast %cst_78 : f32 to vector<16x16xf32>
    %247 = arith.maximumf %245, %246 : vector<16x16xf32>
    %248 = vector.extract_strided_slice %5 {offsets = [32, 0], sizes = [16, 16], strides = [1, 1]} : vector<64x16xf32> to vector<16x16xf32>
    %cst_79 = arith.constant dense<0.000000e+00> : vector<16x16xf32>
    %249 = tpu.matmul %247, %248, %cst_79 {dimension_numbers = #tpu.dot_dimension_numbers<[1], [0], [0], [1], [0, 0, 1, 1], [], []>} : vector<16x16xf32>, vector<16x16xf32>, vector<16x16xf32> -> vector<16x16xf32>
    %250 = arith.addf %222, %249 : vector<16x16xf32>
    %251 = vector.extract_strided_slice %9 {offsets = [16, 48], sizes = [16, 16], strides = [1, 1]} : vector<32x64xf32> to vector<16x16xf32>
    %252 = vector.extract_strided_slice %10 {offsets = [16, 3], sizes = [16, 1], strides = [1, 1]} : vector<32x4xf32> to vector<16x1xf32>
    %253 = vector.extract_strided_slice %11 {offsets = [3, 16], sizes = [1, 16], strides = [1, 1]} : vector<4x32xf32> to vector<1x16xf32>
    %254 = vector.broadcast %252 : vector<16x1xf32> to vector<16x16xf32>
    %255 = vector.broadcast %253 : vector<1x16xf32> to vector<16x16xf32>
    %256 = arith.addf %254, %255 : vector<16x16xf32>
    %cst_80 = arith.constant 0.000000e+00 : f32
    %257 = vector.broadcast %cst_80 : f32 to vector<16x16xf32>
    %258 = arith.cmpf ogt, %256, %257 : vector<16x16xf32>
    %cst_81 = arith.constant 2.000000e-01 : f32
    %259 = vector.broadcast %cst_81 : f32 to vector<16x16xf32>
    %260 = arith.mulf %259, %256 : vector<16x16xf32>
    %261 = arith.select %258, %256, %260 : vector<16x16xi1>, vector<16x16xf32>
    %262 = arith.addf %261, %4 : vector<16x16xf32>
    %cst_82 = arith.constant dense<0xFF800000> : vector<16xf32>
    %263 = vector.multi_reduction <maximumf>, %262, %cst_82 [1] : vector<16x16xf32> to vector<16xf32>
    %264 = vector.shape_cast %263 : vector<16xf32> to vector<16x1xf32>
    %265 = vector.broadcast %264 : vector<16x1xf32> to vector<16x16xf32>
    %266 = arith.subf %262, %265 : vector<16x16xf32>
    %267 = math.exp %266 : vector<16x16xf32>
    %cst_83 = arith.constant dense<0.000000e+00> : vector<16xf32>
    %268 = vector.multi_reduction <add>, %267, %cst_83 [1] : vector<16x16xf32> to vector<16xf32>
    %269 = vector.shape_cast %268 : vector<16xf32> to vector<16x1xf32>
    %270 = tpu.reciprocal %269 {approx = true} : vector<16x1xf32> -> vector<16x1xf32>
    %271 = vector.broadcast %270 : vector<16x1xf32> to vector<16x16xf32>
    %272 = arith.mulf %267, %271 : vector<16x16xf32>
    %cst_84 = arith.constant dense<0.000000e+00> : vector<16x16xf32>
    %273 = tpu.matmul %272, %251, %cst_84 {dimension_numbers = #tpu.dot_dimension_numbers<[1], [0], [0], [1], [0, 0, 1, 1], [], []>} : vector<16x16xf32>, vector<16x16xf32>, vector<16x16xf32> -> vector<16x16xf32>
    %cst_85 = arith.constant 0.000000e+00 : f32
    %274 = vector.broadcast %cst_85 : f32 to vector<16x16xf32>
    %275 = arith.maximumf %273, %274 : vector<16x16xf32>
    %276 = vector.extract_strided_slice %5 {offsets = [48, 0], sizes = [16, 16], strides = [1, 1]} : vector<64x16xf32> to vector<16x16xf32>
    %cst_86 = arith.constant dense<0.000000e+00> : vector<16x16xf32>
    %277 = tpu.matmul %275, %276, %cst_86 {dimension_numbers = #tpu.dot_dimension_numbers<[1], [0], [0], [1], [0, 0, 1, 1], [], []>} : vector<16x16xf32>, vector<16x16xf32>, vector<16x16xf32> -> vector<16x16xf32>
    %278 = arith.addf %250, %277 : vector<16x16xf32>
    %cst_87 = arith.constant dense<0.000000e+00> : vector<16x1xf32>
    %279 = tpu.matmul %278, %7, %cst_87 {dimension_numbers = #tpu.dot_dimension_numbers<[1], [0], [0], [1], [0, 0, 1, 1], [], []>} : vector<16x16xf32>, vector<16x1xf32>, vector<16x1xf32> -> vector<16x1xf32>
    %cst_88 = arith.constant dense<0.000000e+00> : vector<1x16xf32>
    %280 = tpu.matmul %8, %278, %cst_88 {dimension_numbers = #tpu.dot_dimension_numbers<[0], [1], [1], [0], [0, 1, 1, 0], [], []>} : vector<16x1xf32>, vector<16x16xf32>, vector<1x16xf32> -> vector<1x16xf32>
    %281 = vector.broadcast %279 : vector<16x1xf32> to vector<16x16xf32>
    %282 = vector.broadcast %280 : vector<1x16xf32> to vector<16x16xf32>
    %283 = arith.addf %281, %282 : vector<16x16xf32>
    %cst_89 = arith.constant 0.000000e+00 : f32
    %284 = vector.broadcast %cst_89 : f32 to vector<16x16xf32>
    %285 = arith.cmpf ogt, %283, %284 : vector<16x16xf32>
    %cst_90 = arith.constant 2.000000e-01 : f32
    %286 = vector.broadcast %cst_90 : f32 to vector<16x16xf32>
    %287 = arith.mulf %286, %283 : vector<16x16xf32>
    %288 = arith.select %285, %283, %287 : vector<16x16xi1>, vector<16x16xf32>
    %289 = arith.addf %288, %4 : vector<16x16xf32>
    %cst_91 = arith.constant dense<0xFF800000> : vector<16xf32>
    %290 = vector.multi_reduction <maximumf>, %289, %cst_91 [1] : vector<16x16xf32> to vector<16xf32>
    %291 = vector.shape_cast %290 : vector<16xf32> to vector<16x1xf32>
    %292 = vector.broadcast %291 : vector<16x1xf32> to vector<16x16xf32>
    %293 = arith.subf %289, %292 : vector<16x16xf32>
    %294 = math.exp %293 : vector<16x16xf32>
    %cst_92 = arith.constant dense<0.000000e+00> : vector<16xf32>
    %295 = vector.multi_reduction <add>, %294, %cst_92 [1] : vector<16x16xf32> to vector<16xf32>
    %296 = vector.shape_cast %295 : vector<16xf32> to vector<16x1xf32>
    %297 = tpu.reciprocal %296 {approx = true} : vector<16x1xf32> -> vector<16x1xf32>
    %298 = vector.broadcast %297 : vector<16x1xf32> to vector<16x16xf32>
    %299 = arith.mulf %294, %298 : vector<16x16xf32>
    %cst_93 = arith.constant dense<0.000000e+00> : vector<16x16xf32>
    %300 = tpu.matmul %299, %278, %cst_93 {dimension_numbers = #tpu.dot_dimension_numbers<[1], [0], [0], [1], [0, 0, 1, 1], [], []>} : vector<16x16xf32>, vector<16x16xf32>, vector<16x16xf32> -> vector<16x16xf32>
    %cst_94 = arith.constant 0.000000e+00 : f32
    %301 = vector.broadcast %cst_94 : f32 to vector<16x16xf32>
    %302 = arith.cmpf ogt, %300, %301 : vector<16x16xf32>
    %303 = math.exp %300 : vector<16x16xf32>
    %cst_95 = arith.constant 1.000000e+00 : f32
    %304 = vector.broadcast %cst_95 : f32 to vector<16x16xf32>
    %305 = arith.subf %303, %304 : vector<16x16xf32>
    %306 = arith.select %302, %300, %305 : vector<16x16xi1>, vector<16x16xf32>
    %cst_96 = arith.constant dense<0xFF800000> : vector<16xf32>
    %307 = vector.multi_reduction <maximumf>, %306, %cst_96 [1] : vector<16x16xf32> to vector<16xf32>
    %308 = vector.shape_cast %307 : vector<16xf32> to vector<16x1xf32>
    %309 = vector.broadcast %308 : vector<16x1xf32> to vector<16x16xf32>
    %310 = arith.subf %306, %309 : vector<16x16xf32>
    %311 = math.exp %310 : vector<16x16xf32>
    %cst_97 = arith.constant dense<0.000000e+00> : vector<16xf32>
    %312 = vector.multi_reduction <add>, %311, %cst_97 [1] : vector<16x16xf32> to vector<16xf32>
    %313 = vector.shape_cast %312 : vector<16xf32> to vector<16x1xf32>
    %314 = math.log %313 : vector<16x1xf32>
    %315 = vector.broadcast %314 : vector<16x1xf32> to vector<16x16xf32>
    %316 = arith.subf %310, %315 : vector<16x16xf32>
    %c1 = arith.constant 1 : index
    %c0_98 = arith.constant 0 : index
    %c0_99 = arith.constant 0 : index
    %317 = vector.load %arg8[%c1, %c0_98, %c0_99] : memref<2x16x16xf32, #tpu.memory_space<vmem>>, vector<1x16x16xf32>
    %318 = vector.shape_cast %317 : vector<1x16x16xf32> to vector<16x16xf32>
    %319 = vector.shape_cast %316 : vector<16x16xf32> to vector<1x16x16xf32>
    tpu.vector_store %arg8[%c1, %c0_98, %c0_99], %319 {strides = array<i32>} : memref<2x16x16xf32, #tpu.memory_space<vmem>>, vector<1x16x16xf32>,
    return
  }
  func.func @transform_0(%arg0: i32) -> (i32, i32) {
    %c0_i32 = arith.constant 0 : i32
    %c0_i32_0 = arith.constant 0 : i32
    %c0_i32_1 = arith.constant 0 : i32
    return %c0_i32, %c0_i32_0 : i32, i32
  }
  func.func @transform_1(%arg0: i32) -> (i32, i32) {
    %c0_i32 = arith.constant 0 : i32
    %c0_i32_0 = arith.constant 0 : i32
    %c0_i32_1 = arith.constant 0 : i32
    return %c0_i32, %c0_i32_0 : i32, i32
  }
  func.func @transform_2(%arg0: i32) -> (i32, i32) {
    %c0_i32 = arith.constant 0 : i32
    %c0_i32_0 = arith.constant 0 : i32
    %c0_i32_1 = arith.constant 0 : i32
    return %c0_i32, %c0_i32_0 : i32, i32
  }
  func.func @transform_3(%arg0: i32) -> (i32, i32) {
    %c0_i32 = arith.constant 0 : i32
    %c0_i32_0 = arith.constant 0 : i32
    %c0_i32_1 = arith.constant 0 : i32
    return %c0_i32, %c0_i32_0 : i32, i32
  }
  func.func @transform_4(%arg0: i32) -> (i32, i32) {
    %c0_i32 = arith.constant 0 : i32
    %c0_i32_0 = arith.constant 0 : i32
    %c0_i32_1 = arith.constant 0 : i32
    return %c0_i32, %c0_i32_0 : i32, i32
  }
  func.func @transform_5(%arg0: i32) -> (i32, i32) {
    %c0_i32 = arith.constant 0 : i32
    %c0_i32_0 = arith.constant 0 : i32
    %c0_i32_1 = arith.constant 0 : i32
    return %c0_i32, %c0_i32_0 : i32, i32
  }
  func.func @transform_6(%arg0: i32) -> (i32, i32) {
    %c0_i32 = arith.constant 0 : i32
    %c0_i32_0 = arith.constant 0 : i32
    %c0_i32_1 = arith.constant 0 : i32
    return %c0_i32, %c0_i32_0 : i32, i32
  }
  func.func @transform_7(%arg0: i32) -> (i32, i32, i32) {
    %c0_i32 = arith.constant 0 : i32
    %c0_i32_0 = arith.constant 0 : i32
    %c0_i32_1 = arith.constant 0 : i32
    %c0_i32_2 = arith.constant 0 : i32
    return %c0_i32, %c0_i32_0, %c0_i32_1 : i32, i32, i32
  }
}

</mosaic_0001>

<bundles_post_ra>
// kernel: tpu_custom_call.1
= control target key start
LH: loop header
LB: loop body
LE: loop exit
PB: predicated region body
PF: predicated region fallthrough
CT: control target
= control target key end

     0   :  { %vm62_vm0 = vcmask 64512   ;;  %s2265_s0 = inlined_call_operand.vmem [shape: f32[32,8], index: 0, kind: input, shape index: {}]   ;;  %s2266_s1 = inlined_call_operand.vmem [shape: f32[8,64], index: 1, kind: input, shape index: {}]   ;;  %s2267_s2 = inlined_call_operand.vmem [shape: f32[64,4], index: 2, kind: input, shape index: {}]   ;;  %s2268_s3 = inlined_call_operand.vmem [shape: f32[64,4], index: 3, kind: input, shape index: {}]   ;;  %s2269_s4 = inlined_call_operand.vmem [shape: f32[16,16], index: 4, kind: input, shape index: {}]   ;;  %s2270_s5 = inlined_call_operand.vmem [shape: f32[64,16], index: 5, kind: input, shape index: {}]   ;;  %s2271_s6 = inlined_call_operand.vmem [shape: f32[32,1], index: 6, kind: input, shape index: {}]   ;;  %s2272_s7 = inlined_call_operand.hbm [shape: f32[2,16,16], index: 7, kind: output, shape index: {}]  }
   0x1   :  { %v31_v0 = vld [vmem:[%s2266_s1] sm:$0xff] }
   0x2   :  { %v27_v1 = vld [vmem:[%s2265_s0] sm:$0xff]  ;;  %90 = vmatpush.msra.mxu0 %v31_v0 }
   0x3   :  { %v40_v2 = vld [vmem:[%s2268_s3] sm:$0xff]  ;;  %1479 = vmatmul.msk.f32.vlgmr.msra.gmra.mxu0 %vm62_vm0, %v27_v1 }
   0x4   :  { %146 = vxpose.xlu0.b32.start [1/8] (short) (narrow) %v40_v2, 8 }
   0x5   :  { %12 = vsyncpa [#allocation3], 0  ;;  %v28_v3 = vld [vmem:[%s2265_s0 + $0x8] sm:$0xff]  ;;  %v29_v5 = vld [vmem:[%s2265_s0 + $0x10] sm:$0xff]  ;;  %vm104_vm1 = vcmask 523264   ;;  %v1735_v24 = vmov 1  }
   0x6   :  { %v41_v4 = vld [vmem:[%s2268_s3 + $0x8] sm:$0xff]  ;;  %v42_v6 = vld [vmem:[%s2268_s3 + $0x10] sm:$0xff]  ;;  %v30_v7 = vld [vmem:[%s2265_s0 + $0x18] sm:$0xff]  ;;  %1556 = vset.pattern.permute.xlu1 %v1735_v24  ;;  %v1736_v25 = vmov 0   ;;  %v1737_v30 = vmov 2   ;;  %v1738_v32 = vmov 3  }
   0x7   :  { %v43_v8 = vld [vmem:[%s2268_s3 + $0x18] sm:$0xff]  ;;  %v38_v10 = vld [vmem:[%s2267_s2 + $0x30] sm:$0xff]  ;;  %v37_v11 = vld [vmem:[%s2267_s2 + $0x28] sm:$0xff]  ;;  %1557 = vset.pattern.permute.xlu2 %v1736_v25  ;;  %vm222_vm3 = vcmask 130048   ;;  %s1739_s19 = smov 16   ;;  %s1740_s20 = smov 112  }
   0x8   :  { %v39_v9 = vld [vmem:[%s2267_s2 + $0x38] sm:$0xff]  ;;  %v36_v12 = vld [vmem:[%s2267_s2 + $0x20] sm:$0xff]  ;;  %v34_v15 = vld [vmem:[%s2267_s2 + $0x10] sm:$0xff]  ;;  %s1741_s21 = smov 96   ;;  %s1742_s22 = smov 80   ;;  %vm850_vm13 = vcmask 261248  }
   0x9   :  { %125 = vmatpush.msra.mxu1 %v39_v9  ;;  %v44_v13 = vld [vmem:[%s2268_s3 + $0x20] sm:$0xff]  ;;  %v35_v14 = vld [vmem:[%s2267_s2 + $0x18] sm:$0xff]  ;;  %v33_v16 = vld [vmem:[%s2267_s2 + $0x8] sm:$0xff]  ;;  %s1467_s24 = sshll.u32 %s2272_s7, 4  ;;  %s1744_s25 = smov 128   ;;  %s1468_s24 = int_to_ptr.hbm [resolvable:$true] %s1467_s24 }
   0xa   :  { %v45_v17 = vld [vmem:[%s2268_s3 + $0x28] sm:$0xff]  ;;  %v46_v18 = vld [vmem:[%s2268_s3 + $0x30] sm:$0xff]  ;;  %v47_v19 = vld [vmem:[%s2268_s3 + $0x38] sm:$0xff]  ;;  %s1745_s26 = smov 8  }
   0xb   :  { %1480 = vmatmul.msk.f32.gmra.mxu0 %vm62_vm0, %v28_v3  ;;  %126 = vmatpush.msra.mxu1 %v38_v10  ;;  %v32_v20 = vld [vmem:[%s2267_s2] sm:$0xff]  ;;  %v1885_v39 = vld [vmem:[%s2269_s4 + $0x8] sm:$0xff] }
   0xc   :  { %147 = vxpose.xlu0.b32.cont [2/8] (short) (narrow) %v41_v4, 8  ;;  %v1901_v51 = vld [vmem:[%s2269_s4] sm:$0xff] }
   0xd   :  { %127 = vmatpush.msra.mxu1 %v37_v11 }
   0xf   :  { %128 = vmatpush.msra.mxu1 %v36_v12 }
  0x11   :  { %129 = vmatpush.msra.mxu1 %v35_v14 }
  0x13   :  { %1481 = vmatmul.msk.f32.gmra.mxu0 %vm62_vm0, %v29_v5  ;;  %130 = vmatpush.msra.mxu1 %v34_v15 }
  0x14   :  { %148 = vxpose.xlu0.b32.cont [3/8] (short) (narrow) %v42_v6, 8 }
  0x15   :  { %131 = vmatpush.msra.mxu1 %v33_v16 }
  0x17   :  { %132 = vmatpush.msra.mxu1 %v32_v20 }
  0x1b   :  { %1482 = vmatmul.msk.f32.gmra.mxu0 %vm62_vm0, %v30_v7 }
  0x1c   :  { %149 = vxpose.xlu0.b32.cont [4/8] (short) (narrow) %v43_v8, 8 }
  0x24   :  { %150 = vxpose.xlu0.b32.cont [5/8] (short) (narrow) %v44_v13, 8 }
  0x2c   :  { %151 = vxpose.xlu0.b32.cont [6/8] (short) (narrow) %v45_v17, 8 }
  0x34   :  { %152 = vxpose.xlu0.b32.cont [7/8] (short) (narrow) %v46_v18, 8 }
  0x3c   :  { %153 = vxpose.xlu0.b32.end [8/8] (short) (narrow) %v47_v19, 8 }
  0x80   :  { %v92_v21 = vpop.f32.mrf.mxu0 }
  0x81   :  { %1483 = vmatmul.msk.f32.vlgmr.msra.gmra.mxu1 %vm104_vm1, %v92_v21 }
  0x88   :  { %v95_v22 = vpop.f32.mrf.mxu0 }
  0x89   :  { %265 = vmatpush.msrb.mxu0 %v95_v22  ;;  %1542 = vmatpush.msra.mxu3 %v95_v22  ;;  %v1854_v23 = vpack.i.bf16 %v92_v21, %v95_v22 }
  0x8a   :  { %1484 = vmatmul.msk.f32.gmra.mxu1 %vm104_vm1, %v95_v22 }
  0x8b   :  { %266 = vmatpush.msrb.mxu0 %v92_v21  ;;  %1543 = vmatpush.msra.mxu3 %v92_v21 }
  0x90   :  { %v1858_v26 = vpop.f32.mrf.mxu0 }
  0x92   :  { %1485 = vmatmul.msk.f32.gmra.mxu1 %vm104_vm1, %v1858_v26 }
  0x98   :  { %v1862_v27 = vpop.f32.mrf.mxu0 }
  0x99   :  { %1487 = vmatpush.xpose.msk.msra.mxu2 %vm104_vm1, %v1862_v27 }
  0x9a   :  { %1486 = vmatmul.msk.f32.gmra.mxu1 %vm104_vm1, %v1862_v27 }
  0x9d   :  { %1488 = vmatpush.xpose.msk.msra.mxu2 %vm104_vm1, %v1858_v26 }
  0xa1   :  { %1489 = vmatpush.xpose.msk.msra.mxu2 %vm104_vm1, %v95_v22 }
  0xa3   :  { %1580 = vset.pattern.permute.xlu0 %v1735_v24 }
  0xa5   :  { %1490 = vmatpush.xpose.msk.msra.mxu2 %vm104_vm1, %v92_v21 }
  0xa8   :  { %v162_v28 = vpop.trf.xlu0 }
  0xa9   :  { %1491 = vmatmul.msk.f32.vlgmr.msra.gmra.mxu2 %vm104_vm1, %v162_v28 }
  0xfe   :  { %v134_v29 = vpop.f32.mrf.mxu1 }
  0xff   :  { %203 = vperm.xlu2 %1557, %v134_v29   ;;  %277 = vperm.xlu1 %1556, %v134_v29  }
 0x107   :  { %1561 = vset.pattern.permute.xlu2 %v1735_v24  ;;  %1558 = vset.pattern.permute.xlu1 %v1737_v30  ;;  %v137_v31 = vpop.f32.mrf.mxu1 }
 0x108   :  { %413 = vperm.xlu1 %1558, %v134_v29   ;;  %281 = vperm.xlu2 %1561, %v137_v31  }
 0x10f   :  { %v1906_v58 = vpop.f32.mrf.mxu1 }
 0x110   :  { %1559 = vset.pattern.permute.xlu1 %v1738_v32  ;;  %1562 = vset.pattern.permute.xlu2 %v1737_v30 }
 0x111   :  { %522 = vperm.xlu1 %1559, %v134_v29   ;;  %417 = vperm.xlu2 %1562, %v137_v31  }
 0x117   :  { %v1918_v5 = vpop.f32.mrf.mxu1 }
 0x119   :  { %1560 = vset.pattern.permute.xlu1 %v1736_v25  ;;  %1563 = vset.pattern.permute.xlu2 %v1738_v32 }
 0x11a   :  { %526 = vperm.xlu2 %1563, %v137_v31   ;;  %208 = vperm.xlu1 %1560, %v137_v31  }
 0x122   :  { %1579 = vset.pattern.permute.xlu1 %v1735_v24  ;;  %1581 = vset.pattern.permute.xlu2 %v1736_v25 }
 0x12c   :  { %v198_v34 = vpop.f32.mrf.mxu2 }
 0x12d   :  { %v1879_v35 = vperm.slane %v198_v34, 1  ;;  %v1892_v43 = vperm.slane %v198_v34, 0  ;;  %v1896_v49 = vperm.slane %v198_v34, 2  ;;  %v1909_v60 = vperm.slane %v198_v34, 3 }
 0x159   :  { %v204_v33 = vpop.permute.xlu2 %203 }
 0x15a   :  { %v212_v45 = vadd.f32 %v1892_v43, %v204_v33 }
 0x15c   :  { %v216_v50 = vmul.f32 0.2, %v212_v45  ;;  %vm214_vm5 = vcmp.gt.f32.partialorder %v212_v45, 0.0 }
 0x15e   :  { %v218_v57 = vsel %vm214_vm5, %v212_v45, %v216_v50 }
 0x15f   :  { %v220_v59 = vadd.f32 %v218_v57, %v1901_v51 }
 0x161   :  { %v223_v63 = vsel %vm222_vm3, %v220_v59, -inf }
 0x162   :  { %v282_v36 = vpop.permute.xlu2 %281 }
 0x163   :  { %v286_v37 = vadd.f32 %v1879_v35, %v282_v36 }
 0x165   :  { %vm288_vm2 = vcmp.gt.f32.partialorder %v286_v37, 0.0  ;;  %v290_v38 = vmul.f32 0.2, %v286_v37 }
 0x167   :  { %v292_v40 = vsel %vm288_vm2, %v286_v37, %v290_v38 }
 0x168   :  { %v1888_v41 = vadd.f32 %v292_v40, %v1885_v39 }
 0x16a   :  { %v298_v42 = vsel %vm222_vm3, %v1888_v41, -inf }
 0x16b   :  { %299 = vmax.xlane.f32.xlu0 %v298_v42  ;;  %v418_v48 = vpop.permute.xlu2 %417 }
 0x16c   :  { %v422_v55 = vadd.f32 %v1896_v49, %v418_v48 }
 0x16e   :  { %v426_v61 = vmul.f32 0.2, %v422_v55  ;;  %vm424_vm6 = vcmp.gt.f32.partialorder %v422_v55, 0.0 }
 0x170   :  { %v428_v1 = vsel %vm424_vm6, %v422_v55, %v426_v61 }
 0x171   :  { %v278_v44 = vpop.permute.xlu1 %277  ;;  %v1916_v3 = vadd.f32 %v428_v1, %v1885_v39 }
 0x172   :  { %v285_v46 = vadd.f32 %v1879_v35, %v278_v44 }
 0x173   :  { %v434_v6 = vsel %vm222_vm3, %v1916_v3, -inf }
 0x174   :  { %vm287_vm4 = vcmp.gt.f32.partialorder %v285_v46, 0.0  ;;  %v289_v47 = vmul.f32 0.2, %v285_v46  ;;  %v527_v62 = vpop.permute.xlu2 %526 }
 0x175   :  { %v531_v0 = vadd.f32 %v1909_v60, %v527_v62 }
 0x176   :  { %v291_v52 = vsel %vm287_vm4, %v285_v46, %v289_v47 }
 0x177   :  { %v293_v53 = vadd.f32 %v291_v52, %v1901_v51  ;;  %v535_v4 = vmul.f32 0.2, %v531_v0  ;;  %vm533_vm7 = vcmp.gt.f32.partialorder %v531_v0, 0.0 }
 0x179   :  { %v295_v54 = vsel %vm222_vm3, %v293_v53, -inf  ;;  %v537_v7 = vsel %vm533_vm7, %v531_v0, %v535_v4 }
 0x17a   :  { %v414_v56 = vpop.permute.xlu1 %413  ;;  %296 = vmax.xlane.f32.xlu2 %v295_v54  ;;  %v1926_v11 = vadd.f32 %v537_v7, %v1885_v39 }
 0x17b   :  { %v421_v9 = vadd.f32 %v1896_v49, %v414_v56 }
 0x17c   :  { %v543_v14 = vsel %vm222_vm3, %v1926_v11, -inf }
 0x17d   :  { %v425_v13 = vmul.f32 0.2, %v421_v9  ;;  %vm423_vm9 = vcmp.gt.f32.partialorder %v421_v9, 0.0 }
 0x17f   :  { %842 = vrot.lane.b32.xlu0 %v1901_v51, %s1739_s19  ;;  %v427_v19 = vsel %vm423_vm9, %v421_v9, %v425_v13 }
 0x180   :  { %v429_v20 = vadd.f32 %v427_v19, %v1901_v51 }
 0x182   :  { %224 = vmax.xlane.f32.xlu2 %v223_v63  ;;  %v431_v22 = vsel %vm222_vm3, %v429_v20, -inf }
 0x183   :  { %v523_v2 = vpop.permute.xlu1 %522 }
 0x184   :  { %v530_v18 = vadd.f32 %v1909_v60, %v523_v2 }
 0x186   :  { %v534_v21 = vmul.f32 0.2, %v530_v18  ;;  %vm532_vm10 = vcmp.gt.f32.partialorder %v530_v18, 0.0 }
 0x187   :  { %921 = vperm.xlu0 %1580, %v1918_v5  }
 0x188   :  { %v536_v24 = vsel %vm532_vm10, %v530_v18, %v534_v21 }
 0x189   :  { %v538_v28 = vadd.f32 %v536_v24, %v1901_v51 }
 0x18a   :  { %435 = vmax.xlane.f32.xlu2 %v434_v6 }
 0x18b   :  { %v540_v29 = vsel %vm222_vm3, %v538_v28, -inf }
 0x18c   :  { %v209_v8 = vpop.permute.xlu1 %208 }
 0x18d   :  { %v213_v10 = vadd.f32 %v1892_v43, %v209_v8 }
 0x18f   :  { %vm215_vm8 = vcmp.gt.f32.partialorder %v213_v10, 0.0  ;;  %v217_v12 = vmul.f32 0.2, %v213_v10  ;;  %1585 = vset.pattern.permute.xlu0 %v1738_v32 }
 0x190   :  { %1188 = vperm.xlu0 %1585, %v1918_v5  }
 0x191   :  { %v219_v15 = vsel %vm215_vm8, %v213_v10, %v217_v12 }
 0x192   :  { %544 = vmax.xlane.f32.xlu2 %v543_v14  ;;  %v221_v16 = vadd.f32 %v219_v15, %v1885_v39 }
 0x194   :  { %v226_v17 = vsel %vm222_vm3, %v221_v16, -inf }
 0x195   :  { %227 = vmax.xlane.f32.xlu1 %v226_v17 }
 0x198   :  { %1586 = vset.pattern.permute.xlu0 %v1736_v25 }
 0x199   :  { %824 = vperm.xlu0 %1586, %v1906_v58  }
 0x19d   :  { %432 = vmax.xlane.f32.xlu1 %v431_v22 }
 0x1a5   :  { %541 = vmax.xlane.f32.xlu1 %v540_v29 }
 0x1be   :  { %1565 = vrot.lane.b32.xlu1 %v1854_v23, %s1740_s20 }
 0x1de   :  { %v300_v50 = vpop.xlane.xlu0 %299 }
 0x1df   :  { %v302_v55 = vsub.f32 %v1888_v41, %v300_v50 }
 0x1ed   :  { %v297_v31 = vpop.xlane.xlu2 %296 }
 0x1ee   :  { %v301_v33 = vsub.f32 %v293_v53, %v297_v31 }
 0x1f0   :  { %v303_v34 = vmul.f32 1.442695, %v301_v33 }
 0x1f2   :  { %1603 = vpow2.f32 %v303_v34 }
 0x1f5   :  { %v225_v36 = vpop.xlane.xlu2 %224 }
 0x1f6   :  { %v229_v37 = vsub.f32 %v220_v59, %v225_v36  ;;  %v305_v59 = vmul.f32 1.442695, %v302_v55 }
 0x1f8   :  { %v1943_v38 = vpop.eup %1603  ;;  %v231_v40 = vmul.f32 1.442695, %v229_v37 }
 0x1f9   :  { %v307_v42 = vsel %vm222_vm3, %v1943_v38, 0.0 }
 0x1fa   :  { %1605 = vpow2.f32 %v231_v40  ;;  %308 = vadd.xlane.f32.xlu2 %v307_v42 }
 0x1fd   :  { %v436_v61 = vpop.xlane.xlu2 %435 }
 0x1fe   :  { %v438_v63 = vsub.f32 %v1916_v3, %v436_v61 }
 0x200   :  { %v1606_v44 = vpop.eup %1605  ;;  %v441_v1 = vmul.f32 1.442695, %v438_v63 }
 0x201   :  { %v235_v45 = vsel %vm222_vm3, %v1606_v44, 0.0 }
 0x202   :  { %236 = vadd.xlane.f32.xlu2 %v235_v45 }
 0x205   :  { %v545_v15 = vpop.xlane.xlu2 %544 }
 0x208   :  { %v228_v46 = vpop.xlane.xlu1 %227 }
 0x209   :  { %v230_v47 = vsub.f32 %v221_v16, %v228_v46  ;;  %v547_v16 = vsub.f32 %v1926_v11, %v545_v15 }
 0x20b   :  { %v233_v48 = vmul.f32 1.442695, %v230_v47  ;;  %v550_v17 = vmul.f32 1.442695, %v547_v16  ;;  %v2020_v16 = vld [vmem:[%s2270_s5 + $0x10] sm:$0xff] }
 0x20d   :  { %1607 = vpow2.f32 %v233_v48 }
 0x210   :  { %v433_v52 = vpop.xlane.xlu1 %432 }
 0x211   :  { %v437_v53 = vsub.f32 %v429_v20, %v433_v52 }
 0x213   :  { %v1608_v54 = vpop.eup %1607  ;;  %v439_v56 = vmul.f32 1.442695, %v437_v53 }
 0x214   :  { %v238_v57 = vsel %vm222_vm3, %v1608_v54, 0.0 }
 0x215   :  { %1609 = vpow2.f32 %v439_v56  ;;  %239 = vadd.xlane.f32.xlu1 %v238_v57  ;;  %v1984_v56 = vpop.permute.xlu0 %842  ;;  %v1989_v57 = vld [vmem:[%s2270_s5 + $0x8] sm:$0xff] }
 0x216   :  { %1611 = vpow2.f32 %v305_v59  ;;  %403 = vmatpush.msra.mxu0 %v1989_v57  ;;  %v1995_v59 = vld [vmem:[%s2270_s5] sm:$0xff] }
 0x217   :  { %1613 = vpow2.f32 %v441_v1 }
 0x218   :  { %v542_v4 = vpop.xlane.xlu1 %541  ;;  %404 = vmatpush.msra.mxu0 %v1995_v59 }
 0x219   :  { %v546_v10 = vsub.f32 %v538_v28, %v542_v4 }
 0x21b   :  { %v1950_v62 = vpop.eup %1609  ;;  %v548_v12 = vmul.f32 1.442695, %v546_v10 }
 0x21c   :  { %v443_v0 = vsel %vm222_vm3, %v1950_v62, 0.0  ;;  %v1612_v2 = vpop.eup %1611 }
 0x21d   :  { %444 = vadd.xlane.f32.xlu2 %v443_v0  ;;  %v310_v41 = vsel %vm222_vm3, %v1612_v2, 0.0  ;;  %v1956_v6 = vpop.eup %1613  ;;  %1615 = vpow2.f32 %v548_v12  ;;  %v922_v61 = vpop.permute.xlu0 %921 }
 0x21e   :  { %v446_v7 = vsel %vm222_vm3, %v1956_v6, 0.0  ;;  %1617 = vpow2.f32 %v550_v17  ;;  %v925_v63 = vadd.f32 %v922_v61, %v1879_v35  ;;  %v2030_v17 = vld [vmem:[%s2270_s5 + $0x28] sm:$0xff] }
 0x220   :  { %vm927_vm12 = vcmp.gt.f32.partialorder %v925_v63, 0.0 }
 0x223   :  { %v1616_v13 = vpop.eup %1615 }
 0x224   :  { %v552_v14 = vsel %vm222_vm3, %v1616_v13, 0.0  ;;  %v1966_v18 = vpop.eup %1617 }
 0x225   :  { %311 = vadd.xlane.f32.xlu2 %v310_v41  ;;  %v555_v20 = vsel %vm222_vm3, %v1966_v18, 0.0  ;;  %v929_v41 = vmul.f32 0.2, %v925_v63 }
 0x22d   :  { %447 = vadd.xlane.f32.xlu2 %v446_v7 }
 0x22e   :  { %1570 = vrot.lane.b32.xlu1 %v1854_v23, %s1741_s21 }
 0x230   :  { %v1566_v3 = vpop.permute.xlu1 %1565 }
 0x231   :  { %v1567_v8 = vunpack.i.l.bf16 %v1566_v3  ;;  %v1568_v9 = vunpack.i.h.bf16 %v1566_v3 }
 0x233   :  { %343 = vmatpush.msrb.mxu3 %v1567_v8 }
 0x235   :  { %344 = vmatpush.msrb.mxu3 %v1568_v9 }
 0x245   :  { %1575 = vrot.lane.b32.xlu2 %v1854_v23, %s1742_s22 }
 0x258   :  { %553 = vadd.xlane.f32.xlu1 %v552_v14  ;;  %v2014_v14 = vld [vmem:[%s2270_s5 + $0x18] sm:$0xff] }
 0x259   :  { %374 = vmatpush.msrb.mxu2 %v2014_v14 }
 0x25b   :  { %375 = vmatpush.msrb.mxu2 %v2020_v16 }
 0x25d   :  { %510 = vmatpush.msra.mxu2 %v2030_v17 }
 0x26d   :  { %v309_v19 = vpop.xlane.xlu2 %308 }
 0x26e   :  { %556 = vadd.xlane.f32.xlu2 %v555_v20 }
 0x271   :  { %917 = vperm.xlu1 %1579, %v1906_v58  }
 0x275   :  { %v237_v23 = vpop.xlane.xlu2 %236 }
 0x276   :  { %1619 = vrcp.f32 %v237_v23  ;;  %v2044_v23 = vpop.permute.xlu0 %1188 }
 0x279   :  { %844 = vrot.lane.b32.xlu1 %v1885_v39, %s1739_s19 }
 0x27a   :  { %1583 = vset.pattern.permute.xlu1 %v1738_v32 }
 0x27c   :  { %v1620_v21 = vpop.eup %1619 }
 0x27d   :  { %v243_v11 = vmul.f32 %v1620_v21, %v1606_v44 }
 0x27f   :  { %1492 = vmatmul.msk.f32.vlgmr.msrb.gmra.mxu0 %vm222_vm3, %v243_v11 }
 0x288   :  { %v240_v22 = vpop.xlane.xlu1 %239 }
 0x289   :  { %1621 = vrcp.f32 %v240_v22 }
 0x28a   :  { %1623 = vrcp.f32 %v309_v19 }
 0x28f   :  { %v1622_v24 = vpop.eup %1621 }
 0x290   :  { %v445_v28 = vpop.xlane.xlu2 %444  ;;  %v244_v29 = vmul.f32 %v1622_v24, %v1608_v54  ;;  %v1624_v31 = vpop.eup %1623 }
 0x291   :  { %v315_v34 = vmul.f32 %v1624_v31, %v1943_v38  ;;  %v825_v24 = vpop.permute.xlu0 %824 }
 0x292   :  { %1493 = vmatmul.msk.f32.vlgmr.msra.gmra.mxu3 %vm222_vm3, %v244_v29 }
 0x298   :  { %v312_v33 = vpop.xlane.xlu2 %311 }
 0x299   :  { %1625 = vrcp.f32 %v312_v33  ;;  %v2059_v33 = vld [vmem:[%s2270_s5 + $0x30] sm:$0xff] }
 0x29a   :  { %1494 = vmatmul.msk.f32.vlgmr.msrb.gmra.mxu3 %vm222_vm3, %v315_v34  ;;  %1627 = vrcp.f32 %v445_v28 }
 0x29f   :  { %v1626_v32 = vpop.eup %1625 }
 0x2a0   :  { %v1571_v36 = vpop.permute.xlu1 %1570  ;;  %v448_v37 = vpop.xlane.xlu2 %447  ;;  %v316_v40 = vmul.f32 %v1626_v32, %v1612_v2 }
 0x2a1   :  { %v1572_v42 = vunpack.i.l.bf16 %v1571_v36  ;;  %v1573_v44 = vunpack.i.h.bf16 %v1571_v36  ;;  %v1628_v45 = vpop.eup %1627  ;;  %1629 = vrcp.f32 %v448_v37 }
 0x2a2   :  { %1495 = vmatmul.msk.f32.gmra.mxu3 %vm222_vm3, %v316_v40  ;;  %v451_v46 = vmul.f32 %v1628_v45, %v1950_v62 }
 0x2a3   :  { %479 = vmatpush.msra.mxu3 %v1572_v42 }
 0x2a5   :  { %480 = vmatpush.msra.mxu3 %v1573_v44 }
 0x2a7   :  { %v1630_v50 = vpop.eup %1629 }
 0x2a8   :  { %v1576_v47 = vpop.permute.xlu2 %1575  ;;  %v452_v52 = vmul.f32 %v1630_v50, %v1956_v6 }
 0x2a9   :  { %v1577_v38 = vunpack.i.l.bf16 %v1576_v47  ;;  %v1578_v48 = vunpack.i.h.bf16 %v1576_v47 }
 0x2aa   :  { %1500 = vmatmul.msk.f32.vlgmr.msra.gmra.mxu3 %vm222_vm3, %v451_v46 }
 0x2ab   :  { %588 = vmatpush.msrb.mxu1 %v1577_v38 }
 0x2ad   :  { %589 = vmatpush.msrb.mxu1 %v1578_v48 }
 0x2b2   :  { %1501 = vmatmul.msk.f32.gmra.mxu3 %vm222_vm3, %v452_v52 }
 0x2cb   :  { %v554_v53 = vpop.xlane.xlu1 %553 }
 0x2cc   :  { %1631 = vrcp.f32 %v554_v53 }
 0x2d2   :  { %v1632_v54 = vpop.eup %1631 }
 0x2d3   :  { %v560_v55 = vmul.f32 %v1632_v54, %v1616_v13 }
 0x2d5   :  { %1504 = vmatmul.msk.f32.vlgmr.msrb.gmra.mxu1 %vm222_vm3, %v560_v55 }
 0x2e1   :  { %v557_v62 = vpop.xlane.xlu2 %556 }
 0x2e2   :  { %1633 = vrcp.f32 %v557_v62 }
 0x2e3   :  { %v918_v0 = vpop.permute.xlu1 %917 }
 0x2e4   :  { %v924_v1 = vadd.f32 %v918_v0, %v1879_v35  ;;  %v931_v35 = vsel %vm927_vm12, %v925_v63, %v929_v41 }
 0x2e6   :  { %vm926_vm11 = vcmp.gt.f32.partialorder %v924_v1, 0.0  ;;  %v928_v2 = vmul.f32 0.2, %v924_v1 }
 0x2e8   :  { %v1634_v4 = vpop.eup %1633  ;;  %v930_v6 = vsel %vm926_vm11, %v924_v1, %v928_v2 }
 0x2e9   :  { %v561_v7 = vmul.f32 %v1634_v4, %v1966_v18  ;;  %v2002_v3 = vadd.f32 %v930_v6, %v1984_v56  ;;  %v2037_v18 = vld [vmem:[%s2270_s5 + $0x20] sm:$0xff] }
 0x2ea   :  { %511 = vmatpush.msra.mxu2 %v2037_v18 }
 0x2eb   :  { %v2004_v8 = vpop.permute.xlu1 %844  ;;  %1505 = vmatmul.msk.f32.gmra.mxu1 %vm222_vm3, %v561_v7  ;;  %v934_v9 = vsel %vm850_vm13, %v2002_v3, -inf }
 0x2ec   :  { %935 = vmax.xlane.f32.xlu2 %v934_v9  ;;  %v933_v10 = vadd.f32 %v931_v35, %v2004_v8 }
 0x2ee   :  { %v937_v12 = vsel %vm850_vm13, %v933_v10, -inf }
 0x2ef   :  { %938 = vmax.xlane.f32.xlu1 %v937_v12 }
 0x2fc   :  { %v268_v13 = vpop.f32.mrf.mxu0 }
 0x2fd   :  { %v274_v15 = vmax.f32 %v268_v13, 0.0 }
 0x2ff   :  { %1498 = vmatmul.msk.f32.vlgmr.msra.gmra.mxu0 %vm222_vm3, %v274_v15 }
 0x304   :  { %829 = vperm.xlu2 %1581, %v1918_v5  }
 0x308   :  { %1184 = vperm.xlu1 %1583, %v1906_v58  }
 0x30c   :  { %1582 = vset.pattern.permute.xlu2 %v1737_v30 }
 0x30d   :  { %1064 = vperm.xlu2 %1582, %v1906_v58  }
 0x310   :  { %1584 = vset.pattern.permute.xlu1 %v1737_v30  ;;  %v832_v30 = vadd.f32 %v825_v24, %v1892_v43 }
 0x311   :  { %1068 = vperm.xlu1 %1584, %v1918_v5  }
 0x312   :  { %v836_v29 = vmul.f32 0.2, %v832_v30  ;;  %vm834_vm14 = vcmp.gt.f32.partialorder %v832_v30, 0.0 }
 0x314   :  { %v838_v31 = vsel %vm834_vm14, %v832_v30, %v836_v29 }
 0x315   :  { %v271_v19 = vpop.f32.mrf.mxu3  ;;  %1602 = vset.pattern.permute.xlu2 %v1736_v25  ;;  %v2053_v25 = vld [vmem:[%s2270_s5 + $0x38] sm:$0xff]  ;;  %v2063_v36 = vadd.f32 %v1984_v56, %v838_v31 }
 0x316   :  { %v275_v20 = vmax.f32 %v271_v19, 0.0  ;;  %619 = vmatpush.msrb.mxu0 %v2053_v25  ;;  %v2100_v19 = vld [vmem:[%s2271_s6 + $0x8] sm:$0xff] }
 0x317   :  { %v851_v37 = vsel %vm850_vm13, %v2063_v36, -inf  ;;  %650 = vmatpush.msrb.mxu3 %v2100_v19 }
 0x318   :  { %1499 = vmatmul.msk.f32.gmra.mxu0 %vm222_vm3, %v275_v20 }
 0x319   :  { %620 = vmatpush.msrb.mxu0 %v2059_v33 }
 0x31d   :  { %v346_v58 = vpop.f32.mrf.mxu3 }
 0x31e   :  { %v352_v21 = vmax.f32 %v346_v58, 0.0 }
 0x320   :  { %1496 = vmatmul.msk.f32.vlgmr.msrb.gmra.mxu2 %vm222_vm3, %v352_v21 }
 0x325   :  { %v349_v11 = vpop.f32.mrf.mxu3 }
 0x326   :  { %v353_v22 = vmax.f32 %v349_v11, 0.0 }
 0x328   :  { %1497 = vmatmul.msk.f32.gmra.mxu2 %vm222_vm3, %v353_v22 }
 0x32d   :  { %v482_v5 = vpop.f32.mrf.mxu3 }
 0x32e   :  { %v488_v28 = vmax.f32 %v482_v5, 0.0 }
 0x330   :  { %1502 = vmatmul.msk.f32.vlgmr.msra.gmra.mxu2 %vm222_vm3, %v488_v28 }
 0x335   :  { %v485_v34 = vpop.f32.mrf.mxu3 }
 0x336   :  { %v489_v32 = vmax.f32 %v485_v34, 0.0 }
 0x338   :  { %1503 = vmatmul.msk.f32.gmra.mxu2 %vm222_vm3, %v489_v32 }
 0x33b   :  { %852 = vmax.xlane.f32.xlu1 %v851_v37 }
 0x352   :  { %v591_v40 = vpop.f32.mrf.mxu1 }
 0x353   :  { %v597_v42 = vmax.f32 %v591_v40, 0.0 }
 0x355   :  { %1506 = vmatmul.msk.f32.vlgmr.msrb.gmra.mxu0 %vm222_vm3, %v597_v42 }
 0x35f   :  { %v936_v44 = vpop.xlane.xlu2 %935 }
 0x360   :  { %v940_v4 = vsub.f32 %v2002_v3, %v936_v44 }
 0x362   :  { %v939_v45 = vpop.xlane.xlu1 %938  ;;  %v942_v7 = vmul.f32 1.442695, %v940_v4 }
 0x363   :  { %v941_v46 = vsub.f32 %v933_v10, %v939_v45  ;;  %v2125_v45 = vpack.i.bf16 %v1858_v26, %v1862_v27 }
 0x365   :  { %v944_v47 = vmul.f32 1.442695, %v941_v46 }
 0x367   :  { %1635 = vpow2.f32 %v944_v47  ;;  %v830_v38 = vpop.permute.xlu2 %829 }
 0x368   :  { %v833_v48 = vadd.f32 %v830_v38, %v1892_v43  ;;  %v594_v50 = vpop.f32.mrf.mxu1  ;;  %1637 = vpow2.f32 %v942_v7 }
 0x369   :  { %v598_v52 = vmax.f32 %v594_v50, 0.0 }
 0x36a   :  { %vm835_vm15 = vcmp.gt.f32.partialorder %v833_v48, 0.0  ;;  %v837_v53 = vmul.f32 0.2, %v833_v48 }
 0x36b   :  { %1507 = vmatmul.msk.f32.gmra.mxu0 %vm222_vm3, %v598_v52 }
 0x36c   :  { %v839_v54 = vsel %vm835_vm15, %v833_v48, %v837_v53 }
 0x36d   :  { %v2071_v55 = vpop.eup %1635  ;;  %v2074_v61 = vadd.f32 %v2004_v8, %v839_v54 }
 0x36e   :  { %950 = vrot.lane.b32.xlu0 %v2071_v55, %s1740_s20  ;;  %v2088_v12 = vpop.eup %1637 }
 0x36f   :  { %v1065_v62 = vpop.permute.xlu2 %1064  ;;  %v854_v63 = vsel %vm850_vm13, %v2074_v61, -inf }
 0x370   :  { %v1071_v43 = vadd.f32 %v1065_v62, %v1896_v49  ;;  %855 = vmax.xlane.f32.xlu2 %v854_v63 }
 0x372   :  { %vm1073_vm0 = vcmp.gt.f32.partialorder %v1071_v43, 0.0  ;;  %v1075_v0 = vmul.f32 0.2, %v1071_v43 }
 0x374   :  { %v1077_v1 = vsel %vm1073_vm0, %v1071_v43, %v1075_v0 }
 0x375   :  { %v2082_v2 = vadd.f32 %v1077_v1, %v1984_v56 }
 0x377   :  { %v1081_v41 = vsel %vm850_vm13, %v2082_v2, -inf }
 0x378   :  { %1082 = vmax.xlane.f32.xlu1 %v1081_v41 }
 0x37a   :  { %v1185_v6 = vpop.permute.xlu1 %1184 }
 0x37b   :  { %v1191_v46 = vadd.f32 %v1185_v6, %v1909_v60  ;;  %v1192_v6 = vadd.f32 %v2044_v23, %v1909_v60 }
 0x37c   :  { %v406_v58 = vpop.f32.mrf.mxu0 }
 0x37d   :  { %v1195_v47 = vmul.f32 0.2, %v1191_v46  ;;  %vm1193_vm2 = vcmp.gt.f32.partialorder %v1191_v46, 0.0  ;;  %vm1194_vm4 = vcmp.gt.f32.partialorder %v1192_v6, 0.0 }
 0x37f   :  { %v1197_v38 = vsel %vm1193_vm2, %v1191_v46, %v1195_v47 }
 0x383   :  { %v1069_v9 = vpop.permute.xlu1 %1068 }
 0x384   :  { %v1072_v35 = vadd.f32 %v1069_v9, %v1896_v49  ;;  %v2106_v49 = vld [vmem:[%s2271_s6] sm:$0xff] }
 0x385   :  { %651 = vmatpush.msrb.mxu3 %v2106_v49 }
 0x386   :  { %vm1074_vm1 = vcmp.gt.f32.partialorder %v1072_v35, 0.0  ;;  %v1076_v10 = vmul.f32 0.2, %v1072_v35 }
 0x387   :  { %1025 = vmatpush.msra.mxu3 %v2014_v14 }
 0x388   :  { %948 = vrot.lane.b32.xlu2 %v2088_v12, %s1740_s20  ;;  %v1078_v13 = vsel %vm1074_vm1, %v1072_v35, %v1076_v10 }
 0x389   :  { %v2093_v15 = vadd.f32 %v1078_v13, %v2004_v8  ;;  %1026 = vmatpush.msra.mxu3 %v2020_v16 }
 0x38b   :  { %v1084_v3 = vsel %vm850_vm13, %v2093_v15, -inf }
 0x38c   :  { %1085 = vmax.xlane.f32.xlu1 %v1084_v3 }
 0x395   :  { %v409_v11 = vpop.f32.mrf.mxu0 }
 0x3a3   :  { %v377_v20 = vpop.f32.mrf.mxu2 }
 0x3a4   :  { %v407_v24 = vadd.f32 %v406_v58, %v377_v20 }
 0x3ab   :  { %v380_v21 = vpop.f32.mrf.mxu2 }
 0x3ac   :  { %v410_v32 = vadd.f32 %v409_v11, %v380_v21 }
 0x3b3   :  { %v513_v22 = vpop.f32.mrf.mxu2 }
 0x3b4   :  { %v519_v30 = vadd.f32 %v513_v22, %v407_v24 }
 0x3bb   :  { %v516_v14 = vpop.f32.mrf.mxu2 }
 0x3bc   :  { %v520_v16 = vadd.f32 %v516_v14, %v410_v32 }
 0x3d2   :  { %v622_v5 = vpop.f32.mrf.mxu0 }
 0x3d3   :  { %v628_v28 = vadd.f32 %v622_v5, %v519_v30 }
 0x3d5   :  { %1508 = vmatmul.msk.f32.vlgmr.msrb.gmra.mxu3 %vm222_vm3, %v628_v28 }
 0x3e0   :  { %v951_v29 = vpop.permute.xlu0 %950 }
 0x3e1   :  { %v957_v31 = vsel %vm222_vm3, %v951_v29, 0.0 }
 0x3e2   :  { %958 = vadd.xlane.f32.xlu2 %v957_v31 }
 0x3e3   :  { %v2113_v34 = vpop.xlane.xlu2 %855 }
 0x3e4   :  { %v858_v13 = vsub.f32 %v2074_v61, %v2113_v34 }
 0x3e6   :  { %v861_v3 = vmul.f32 1.442695, %v858_v13 }
 0x3e8   :  { %v625_v37 = vpop.f32.mrf.mxu0 }
 0x3e9   :  { %v629_v40 = vadd.f32 %v625_v37, %v520_v16 }
 0x3eb   :  { %v949_v42 = vpop.permute.xlu2 %948  ;;  %1509 = vmatmul.msk.f32.gmra.mxu3 %vm222_vm3, %v629_v40  ;;  %1510 = vmatpush.xpose.msk.msrb.mxu2 %vm222_vm3, %v629_v40 }
 0x3ec   :  { %777 = vmatpush.msra.mxu1 %v629_v40  ;;  %v954_v44 = vsel %vm222_vm3, %v949_v42, 0.0 }
 0x3ed   :  { %955 = vadd.xlane.f32.xlu0 %v954_v44 }
 0x3ee   :  { %778 = vmatpush.msra.mxu1 %v628_v28 }
 0x3ef   :  { %1511 = vmatpush.xpose.msk.msrb.mxu2 %vm222_vm3, %v628_v28 }
 0x3f0   :  { %1054 = vmatpush.msrb.mxu1 %v1989_v57  ;;  %v1199_v57 = vadd.f32 %v1197_v38, %v1984_v56 }
 0x3f2   :  { %1055 = vmatpush.msrb.mxu1 %v1995_v59  ;;  %v1201_v48 = vsel %vm850_vm13, %v1199_v57, -inf  ;;  %v853_v59 = vpop.xlane.xlu1 %852 }
 0x3f3   :  { %905 = vmatpush.msra.mxu2 %v1862_v27  ;;  %v857_v50 = vsub.f32 %v2063_v36, %v853_v59 }
 0x3f5   :  { %906 = vmatpush.msra.mxu2 %v1858_v26  ;;  %v859_v52 = vmul.f32 1.442695, %v857_v50 }
 0x3f7   :  { %1639 = vpow2.f32 %v859_v52 }
 0x3fa   :  { %1588 = vrot.lane.b32.xlu2 %v2125_v45, %s1740_s20  ;;  %v1083_v53 = vpop.xlane.xlu1 %1082 }
 0x3fb   :  { %v1087_v26 = vsub.f32 %v2082_v2, %v1083_v53 }
 0x3fd   :  { %v1089_v27 = vmul.f32 1.442695, %v1087_v26  ;;  %v2134_v54 = vpop.eup %1639 }
 0x3ff   :  { %1641 = vpow2.f32 %v1089_v27 }
 0x402   :  { %v1086_v20 = vpop.xlane.xlu1 %1085 }
 0x405   :  { %v2138_v62 = vpop.eup %1641 }
 0x423   :  { %1202 = vmax.xlane.f32.xlu2 %v1201_v48 }
 0x43b   :  { %865 = vrot.lane.b32.xlu2 %v2134_v54, %s1740_s20 }
 0x443   :  { %1095 = vrot.lane.b32.xlu2 %v2138_v62, %s1740_s20 }
 0x455   :  { %v959_v56 = vpop.xlane.xlu2 %958 }
 0x458   :  { %v653_v53 = vpop.f32.mrf.mxu3 }
 0x45d   :  { %v1589_v63 = vpop.permute.xlu2 %1588 }
 0x45e   :  { %v1590_v36 = vunpack.i.l.bf16 %v1589_v63  ;;  %v1591_v43 = vunpack.i.h.bf16 %v1589_v63 }
 0x460   :  { %994 = vmatpush.msra.mxu0 %v1590_v36  ;;  %v956_v0 = vpop.xlane.xlu0 %955 }
 0x461   :  { %1643 = vrcp.f32 %v956_v0 }
 0x462   :  { %995 = vmatpush.msra.mxu0 %v1591_v43  ;;  %1645 = vrcp.f32 %v959_v56 }
 0x464   :  { %1172 = vmatpush.msrb.mxu0 %v2030_v17  ;;  %v60_v17 = vld [vmem:[%s2271_s6 + $0x10] sm:$0xff] }
 0x465   :  { %659 = vxpose.xlu1.b32.start [1/2] (short) (narrow) %v60_v17, 8 }
 0x466   :  { %1173 = vmatpush.msrb.mxu0 %v2037_v18  ;;  %v1196_v18 = vmul.f32 0.2, %v1192_v6 }
 0x467   :  { %v1644_v1 = vpop.eup %1643 }
 0x468   :  { %v962_v2 = vmul.f32 %v1644_v1, %v2088_v12  ;;  %v1646_v41 = vpop.eup %1645  ;;  %v1198_v9 = vsel %vm1194_vm4, %v1192_v6, %v1196_v18 }
 0x469   :  { %v963_v4 = vmul.f32 %v1646_v41, %v2071_v55  ;;  %v1200_v10 = vadd.f32 %v1198_v9, %v2004_v8  ;;  %v61_v55 = vld [vmem:[%s2271_s6 + $0x18] sm:$0xff]  ;;  %v1088_v8 = vsub.f32 %v2093_v15, %v1086_v20 }
 0x46a   :  { %966 = vrot.lane.b32.xlu0 %v962_v2, %s1740_s20 }
 0x46b   :  { %v1204_v60 = vsel %vm850_vm13, %v1200_v10, -inf  ;;  %v1091_v58 = vmul.f32 1.442695, %v1088_v8 }
 0x46d   :  { %660 = vxpose.xlu1.b32.end [2/2] (short) (narrow) %v61_v55, 8 }
 0x46e   :  { %v656_v63 = vpop.f32.mrf.mxu3 }
 0x472   :  { %968 = vrot.lane.b32.xlu0 %v963_v4, %s1740_s20 }
 0x496   :  { %v1203_v7 = vpop.xlane.xlu2 %1202 }
 0x497   :  { %v1207_v35 = vsub.f32 %v1199_v57, %v1203_v7 }
 0x499   :  { %v1209_v12 = vmul.f32 1.442695, %v1207_v35 }
 0x49b   :  { %1647 = vpow2.f32 %v1209_v12 }
 0x49c   :  { %1205 = vmax.xlane.f32.xlu0 %v1204_v60  ;;  %1649 = vpow2.f32 %v861_v3 }
 0x49d   :  { %1651 = vpow2.f32 %v1091_v58 }
 0x49e   :  { %v866_v61 = vpop.permute.xlu2 %865 }
 0x49f   :  { %v871_v24 = vsel %vm222_vm3, %v866_v61, 0.0 }
 0x4a1   :  { %v1648_v23 = vpop.eup %1647 }
 0x4a2   :  { %1215 = vrot.lane.b32.xlu2 %v1648_v23, %s1740_s20  ;;  %v1650_v21 = vpop.eup %1649 }
 0x4a3   :  { %v2163_v11 = vpop.eup %1651 }
 0x4a6   :  { %v1096_v15 = vpop.permute.xlu2 %1095 }
 0x4a7   :  { %v1101_v40 = vsel %vm222_vm3, %v1096_v15, 0.0 }
 0x4b0   :  { %867 = vrot.lane.b32.xlu0 %v1650_v21, %s1740_s20 }
 0x4b8   :  { %1097 = vrot.lane.b32.xlu0 %v2163_v11, %s1740_s20 }
 0x4dc   :  { %v967_v22 = vpop.permute.xlu0 %966 }
 0x4dd   :  { %1519 = vmatmul.msk.f32.vlgmr.msra.gmra.mxu0 %vm222_vm3, %v967_v22 }
 0x4e2   :  { %872 = vadd.xlane.f32.xlu0 %v871_v24 }
 0x4e4   :  { %v969_v30 = vpop.permute.xlu0 %968 }
 0x4e5   :  { %1520 = vmatmul.msk.f32.gmra.mxu0 %vm222_vm3, %v969_v30 }
 0x4fc   :  { %v1216_v5 = vpop.permute.xlu2 %1215 }
 0x4fd   :  { %v1221_v28 = vsel %vm222_vm3, %v1216_v5, 0.0 }
 0x4fe   :  { %1222 = vadd.xlane.f32.xlu0 %v1221_v28 }
 0x509   :  { %v2176_v37 = vpop.trf.xlu1 }
 0x50a   :  { %1512 = vmatmul.msk.f32.vlgmr.msrb.gmra.mxu2 %vm222_vm3, %v2176_v37 }
 0x50f   :  { %v1206_v29 = vpop.xlane.xlu0 %1205 }
 0x510   :  { %v1208_v31 = vsub.f32 %v1200_v10, %v1206_v29 }
 0x512   :  { %v1211_v34 = vmul.f32 1.442695, %v1208_v31 }
 0x514   :  { %1653 = vpow2.f32 %v1211_v34 }
 0x51a   :  { %v2171_v14 = vpop.eup %1653 }
 0x51b   :  { %1217 = vrot.lane.b32.xlu2 %v2171_v14, %s1740_s20 }
 0x522   :  { %v868_v32 = vpop.permute.xlu0 %867 }
 0x523   :  { %v874_v16 = vsel %vm222_vm3, %v868_v32, 0.0 }
 0x524   :  { %875 = vadd.xlane.f32.xlu1 %v874_v16 }
 0x52a   :  { %v1098_v42 = vpop.permute.xlu0 %1097 }
 0x52b   :  { %v1104_v44 = vsel %vm222_vm3, %v1098_v42, 0.0 }
 0x544   :  { %1102 = vadd.xlane.f32.xlu2 %v1101_v40 }
 0x54c   :  { %1105 = vadd.xlane.f32.xlu2 %v1104_v44 }
 0x555   :  { %v873_v46 = vpop.xlane.xlu0 %872 }
 0x556   :  { %1655 = vrcp.f32 %v873_v46 }
 0x55a   :  { %v997_v47 = vpop.f32.mrf.mxu0 }
 0x55b   :  { %v1003_v38 = vmax.f32 %v997_v47, 0.0 }
 0x55c   :  { %v1656_v57 = vpop.eup %1655 }
 0x55d   :  { %1521 = vmatmul.msk.f32.vlgmr.msra.gmra.mxu3 %vm222_vm3, %v1003_v38  ;;  %v879_v59 = vmul.f32 %v1656_v57, %v2134_v54 }
 0x562   :  { %v1000_v48 = vpop.f32.mrf.mxu0 }
 0x563   :  { %v1004_v50 = vmax.f32 %v1000_v48, 0.0 }
 0x564   :  { %883 = vrot.lane.b32.xlu2 %v879_v59, %s1740_s20 }
 0x565   :  { %1522 = vmatmul.msk.f32.gmra.mxu3 %vm222_vm3, %v1004_v50 }
 0x56c   :  { %1593 = vrot.lane.b32.xlu2 %v2125_v45, %s1741_s21 }
 0x571   :  { %v1223_v52 = vpop.xlane.xlu0 %1222 }
 0x572   :  { %1657 = vrcp.f32 %v1223_v52 }
 0x574   :  { %1598 = vrot.lane.b32.xlu2 %v2125_v45, %s1742_s22 }
 0x575   :  { %v1218_v26 = vpop.permute.xlu2 %1217 }
 0x576   :  { %v1224_v27 = vsel %vm222_vm3, %v1218_v26, 0.0 }
 0x577   :  { %1225 = vadd.xlane.f32.xlu0 %v1224_v27 }
 0x578   :  { %v1658_v56 = vpop.eup %1657 }
 0x579   :  { %v1229_v54 = vmul.f32 %v1658_v56, %v1648_v23 }
 0x57b   :  { %1233 = vrot.lane.b32.xlu1 %v1229_v54, %s1740_s20 }
 0x57c   :  { %721 = vperm.xlu2 %1602, %v656_v63  }
 0x58d   :  { %v711_v13 = vpop.f32.mrf.mxu2 }
 0x58e   :  { %v724_v3 = vperm.slane %v711_v13, 0 }
 0x597   :  { %v876_v36 = vpop.xlane.xlu1 %875 }
 0x598   :  { %1659 = vrcp.f32 %v876_v36 }
 0x59e   :  { %v1660_v43 = vpop.eup %1659 }
 0x59f   :  { %v880_v0 = vmul.f32 %v1660_v43, %v1650_v21 }
 0x5a1   :  { %885 = vrot.lane.b32.xlu0 %v880_v0, %s1740_s20 }
 0x5a9   :  { %716 = vperm.xlu0 %1586, %v653_v53  }
 0x5b7   :  { %v1103_v1 = vpop.xlane.xlu2 %1102 }
 0x5b8   :  { %1661 = vrcp.f32 %v1103_v1 }
 0x5be   :  { %v1662_v45 = vpop.eup %1661 }
 0x5bf   :  { %v1106_v2 = vpop.xlane.xlu2 %1105  ;;  %v1109_v41 = vmul.f32 %v1662_v45, %v2138_v62 }
 0x5c0   :  { %1663 = vrcp.f32 %v1106_v2 }
 0x5c1   :  { %1113 = vrot.lane.b32.xlu0 %v1109_v41, %s1740_s20 }
 0x5c6   :  { %v1664_v4 = vpop.eup %1663 }
 0x5c7   :  { %v884_v6 = vpop.permute.xlu2 %883  ;;  %v1110_v17 = vmul.f32 %v1664_v4, %v2163_v11 }
 0x5c8   :  { %1517 = vmatmul.msk.f32.vlgmr.msra.gmra.mxu2 %vm222_vm3, %v884_v6 }
 0x5c9   :  { %1115 = vrot.lane.b32.xlu0 %v1110_v17, %s1740_s20 }
 0x5cf   :  { %v1594_v18 = vpop.permute.xlu2 %1593 }
 0x5d0   :  { %v1595_v7 = vunpack.i.l.bf16 %v1594_v18  ;;  %v1596_v9 = vunpack.i.h.bf16 %v1594_v18 }
 0x5d2   :  { %1141 = vmatpush.msrb.mxu2 %v1595_v7 }
 0x5d4   :  { %1142 = vmatpush.msrb.mxu2 %v1596_v9 }
 0x5d6   :  { %1323 = vmatpush.msra.mxu2 %v2100_v19 }
 0x5d7   :  { %v1599_v35 = vpop.permute.xlu2 %1598 }
 0x5d8   :  { %1324 = vmatpush.msra.mxu2 %v2106_v49  ;;  %v1600_v62 = vunpack.i.l.bf16 %v1599_v35  ;;  %v1601_v10 = vunpack.i.h.bf16 %v1599_v35 }
 0x5da   :  { %1261 = vmatpush.msrb.mxu3 %v1600_v62 }
 0x5dc   :  { %1262 = vmatpush.msrb.mxu3 %v1601_v10 }
 0x5df   :  { %v722_v19 = vpop.permute.xlu2 %721 }
 0x5e0   :  { %v726_v20 = vadd.f32 %v724_v3, %v722_v19  ;;  %v1028_v63 = vpop.f32.mrf.mxu3 }
 0x5e2   :  { %v730_v8 = vmul.f32 0.2, %v726_v20  ;;  %vm728_vm5 = vcmp.gt.f32.partialorder %v726_v20, 0.0 }
 0x5e4   :  { %v732_v58 = vsel %vm728_vm5, %v726_v20, %v730_v8 }
 0x5e5   :  { %v734_v21 = vadd.f32 %v732_v58, %v1885_v39 }
 0x5e7   :  { %v738_v61 = vsel %vm222_vm3, %v734_v21, -inf }
 0x5e8   :  { %v1031_v43 = vpop.f32.mrf.mxu3 }
 0x5ea   :  { %v1226_v55 = vpop.xlane.xlu0 %1225 }
 0x5eb   :  { %1665 = vrcp.f32 %v1226_v55 }
 0x5ed   :  { %v1234_v12 = vpop.permute.xlu1 %1233 }
 0x5ee   :  { %1529 = vmatmul.msk.f32.vlgmr.msrb.gmra.mxu3 %vm222_vm3, %v1234_v12 }
 0x5f1   :  { %v1666_v60 = vpop.eup %1665 }
 0x5f2   :  { %v1230_v23 = vmul.f32 %v1666_v60, %v2171_v14 }
 0x5f4   :  { %1235 = vrot.lane.b32.xlu2 %v1230_v23, %s1740_s20 }
 0x613   :  { %v886_v49 = vpop.permute.xlu0 %885 }
 0x614   :  { %1518 = vmatmul.msk.f32.gmra.mxu2 %vm222_vm3, %v886_v49 }
 0x61b   :  { %v717_v11 = vpop.permute.xlu0 %716 }
 0x61c   :  { %v725_v22 = vadd.f32 %v724_v3, %v717_v11 }
 0x61d   :  { %739 = vmax.xlane.f32.xlu2 %v738_v61 }
 0x61e   :  { %vm727_vm6 = vcmp.gt.f32.partialorder %v725_v22, 0.0  ;;  %v729_v24 = vmul.f32 0.2, %v725_v22 }
 0x620   :  { %v731_v30 = vsel %vm727_vm6, %v725_v22, %v729_v24  ;;  %v1707_v24 = vld [vmem:[%s2269_s4] sm:$0xff] }
 0x621   :  { %v733_v15 = vadd.f32 %v731_v30, %v1901_v51 }
 0x623   :  { %v735_v5 = vsel %vm222_vm3, %v733_v15, -inf }
 0x624   :  { %736 = vmax.xlane.f32.xlu0 %v735_v5 }
 0x633   :  { %v1114_v28 = vpop.permute.xlu0 %1113 }
 0x634   :  { %1525 = vmatmul.msk.f32.vlgmr.msrb.gmra.mxu2 %vm222_vm3, %v1114_v28 }
 0x63b   :  { %v1116_v29 = vpop.permute.xlu0 %1115 }
 0x63c   :  { %1526 = vmatmul.msk.f32.gmra.mxu2 %vm222_vm3, %v1116_v29 }
 0x64b   :  { %v908_v47 = vpop.f32.mrf.mxu2 }
 0x64c   :  { %v914_v36 = vmax.f32 %v908_v47, 0.0 }
 0x64e   :  { %v1236_v39 = vpop.permute.xlu2 %1235 }
 0x64f   :  { %1530 = vmatmul.msk.f32.gmra.mxu3 %vm222_vm3, %v1236_v39 }
 0x671   :  { %v1264_v1 = vpop.f32.mrf.mxu3 }
 0x672   :  { %v1270_v45 = vmax.f32 %v1264_v1, 0.0 }
 0x690   :  { %v740_v31 = vpop.xlane.xlu2 %739 }
 0x691   :  { %v742_v34 = vsub.f32 %v734_v21, %v740_v31  ;;  %v1708_v31 = vld [vmem:[%s2269_s4 + $0x8] sm:$0xff]  ;;  %s1743_s4 = smov [#allocation2]  }
 0x692   :  { %s1465_s22 = sshll.u32 %s1743_s4, 4  ;;  %s1466_s22 = int_to_ptr.vmem [resolvable:$true] %s1465_s22 }
 0x693   :  { %v745_v14 = vmul.f32 1.442695, %v742_v34 }
 0x695   :  { %1667 = vpow2.f32 %v745_v14 }
 0x697   :  { %v737_v32 = vpop.xlane.xlu0 %736  ;;  %v911_v38 = vpop.f32.mrf.mxu2 }
 0x698   :  { %v741_v16 = vsub.f32 %v733_v15, %v737_v32  ;;  %v915_v0 = vmax.f32 %v911_v38, 0.0 }
 0x69a   :  { %v743_v40 = vmul.f32 1.442695, %v741_v16 }
 0x69b   :  { %v1668_v51 = vpop.eup %1667 }
 0x69c   :  { %1669 = vpow2.f32 %v743_v40  ;;  %v750_v42 = vsel %vm222_vm3, %v1668_v51, 0.0 }
 0x69d   :  { %751 = vadd.xlane.f32.xlu0 %v750_v42 }
 0x6a2   :  { %v1670_v44 = vpop.eup %1669 }
 0x6a3   :  { %v747_v46 = vsel %vm222_vm3, %v1670_v44, 0.0 }
 0x6a4   :  { %748 = vadd.xlane.f32.xlu1 %v747_v46 }
 0x6b7   :  { %v1144_v57 = vpop.f32.mrf.mxu2 }
 0x6b8   :  { %v1150_v48 = vmax.f32 %v1144_v57, 0.0 }
 0x6ba   :  { %1527 = vmatmul.msk.f32.vlgmr.msrb.gmra.mxu0 %vm222_vm3, %v1150_v48 }
 0x6bf   :  { %v1147_v59 = vpop.f32.mrf.mxu2 }
 0x6c0   :  { %v1151_v50 = vmax.f32 %v1147_v59, 0.0 }
 0x6c2   :  { %1528 = vmatmul.msk.f32.gmra.mxu0 %vm222_vm3, %v1151_v50 }
 0x6d2   :  { %v1267_v2 = vpop.f32.mrf.mxu3 }
 0x710   :  { %v752_v53 = vpop.xlane.xlu0 %751 }
 0x717   :  { %v749_v52 = vpop.xlane.xlu1 %748 }
 0x718   :  { %1671 = vrcp.f32 %v749_v52 }
 0x719   :  { %1673 = vrcp.f32 %v752_v53 }
 0x71e   :  { %v1672_v26 = vpop.eup %1671 }
 0x71f   :  { %v755_v27 = vmul.f32 %v1672_v26, %v1670_v44  ;;  %v1674_v56 = vpop.eup %1673 }
 0x720   :  { %v756_v54 = vmul.f32 %v1674_v56, %v1668_v51 }
 0x721   :  { %1513 = vmatmul.msk.f32.vlgmr.msra.gmra.mxu1 %vm222_vm3, %v755_v27 }
 0x722   :  { %1292 = vmatpush.msra.mxu1 %v2053_v25  ;;  %v1271_v25 = vmax.f32 %v1267_v2, 0.0 }
 0x724   :  { %1293 = vmatpush.msra.mxu1 %v2059_v33 }
 0x729   :  { %1514 = vmatmul.msk.f32.gmra.mxu1 %vm222_vm3, %v756_v54 }
 0x731   :  { %1523 = vmatmul.msk.f32.vlgmr.msrb.gmra.mxu1 %vm222_vm3, %v914_v36 }
 0x737   :  { %v1175_v18 = vpop.f32.mrf.mxu0 }
 0x739   :  { %1524 = vmatmul.msk.f32.gmra.mxu1 %vm222_vm3, %v915_v0 }
 0x73f   :  { %v1178_v10 = vpop.f32.mrf.mxu0 }
 0x741   :  { %1531 = vmatmul.msk.f32.vlgmr.msra.gmra.mxu1 %vm222_vm3, %v1270_v45 }
 0x749   :  { %1532 = vmatmul.msk.f32.gmra.mxu1 %vm222_vm3, %v1271_v25 }
 0x79e   :  { %v780_v33 = vpop.f32.mrf.mxu1 }
 0x79f   :  { %v788_v3 = vmul.f32 1.442695, %v780_v33  ;;  %vm786_vm7 = vcmp.gt.f32.partialorder %v780_v33, 0.0 }
 0x7a1   :  { %1675 = vpow2.f32 %v788_v3 }
 0x7a6   :  { %v2223_v41 = vpop.f32.mrf.mxu1 }
 0x7a7   :  { %v1676_v19 = vpop.eup %1675  ;;  %v790_v44 = vmul.f32 1.442695, %v2223_v41  ;;  %vm787_vm10 = vcmp.gt.f32.partialorder %v2223_v41, 0.0 }
 0x7a8   :  { %v1515_v20 = vadd.f32 -1.0, %v1676_v19 }
 0x7aa   :  { %v2231_v8 = vsel %vm786_vm7, %v780_v33, %v1515_v20 }
 0x7ab   :  { %v796_v49 = vsel %vm222_vm3, %v2231_v8, -inf }
 0x7ae   :  { %v1057_v4 = vpop.f32.mrf.mxu1 }
 0x7af   :  { %v1058_v17 = vadd.f32 %v1057_v4, %v1028_v63 }
 0x7b1   :  { %v1181_v7 = vadd.f32 %v1175_v18, %v1058_v17 }
 0x7b6   :  { %v1060_v6 = vpop.f32.mrf.mxu1 }
 0x7b7   :  { %v1061_v62 = vadd.f32 %v1060_v6, %v1031_v43 }
 0x7b9   :  { %v1182_v55 = vadd.f32 %v1178_v10, %v1061_v62 }
 0x7be   :  { %v1295_v9 = vpop.f32.mrf.mxu1 }
 0x7bf   :  { %v1301_v35 = vadd.f32 %v1295_v9, %v1181_v7 }
 0x7c1   :  { %1533 = vmatmul.msk.f32.vlgmr.msra.gmra.mxu2 %vm222_vm3, %v1301_v35 }
 0x7c6   :  { %v1298_v12 = vpop.f32.mrf.mxu1 }
 0x7c7   :  { %v1302_v60 = vadd.f32 %v1298_v12, %v1182_v55 }
 0x7c9   :  { %1534 = vmatmul.msk.f32.gmra.mxu2 %vm222_vm3, %v1302_v60  ;;  %1535 = vmatpush.xpose.msk.msra.mxu0 %vm222_vm3, %v1302_v60 }
 0x7ca   :  { %1415 = vmatpush.msra.mxu3 %v1302_v60 }
 0x7cc   :  { %1416 = vmatpush.msra.mxu3 %v1301_v35 }
 0x7cd   :  { %1536 = vmatpush.xpose.msk.msra.mxu0 %vm222_vm3, %v1301_v35 }
 0x7d0   :  { %1537 = vmatmul.msk.f32.vlgmr.msra.gmra.mxu0 %vm222_vm3, %v2176_v37 }
 0x844   :  { %v1326_v23 = vpop.f32.mrf.mxu2 }
 0x845   :  { %1354 = vperm.xlu2 %1602, %v1326_v23  }
 0x84c   :  { %v1329_v13 = vpop.f32.mrf.mxu2 }
 0x84d   :  { %1359 = vperm.xlu0 %1586, %v1329_v13   ;;  %v1349_v58 = vpop.f32.mrf.mxu0 }
 0x84e   :  { %v1362_v21 = vperm.slane %v1349_v58, 0 }
 0x877   :  { %797 = vmax.xlane.f32.xlu0 %v796_v49 }
 0x89f   :  { %v1355_v11 = vpop.permute.xlu2 %1354 }
 0x8a0   :  { %v1363_v22 = vadd.f32 %v1362_v21, %v1355_v11 }
 0x8a2   :  { %vm1365_vm8 = vcmp.gt.f32.partialorder %v1363_v22, 0.0  ;;  %v1367_v37 = vmul.f32 0.2, %v1363_v22 }
 0x8a4   :  { %v1369_v61 = vsel %vm1365_vm8, %v1363_v22, %v1367_v37 }
 0x8a5   :  { %v1371_v30 = vadd.f32 %v1707_v24, %v1369_v61 }
 0x8a7   :  { %v1373_v15 = vsel %vm222_vm3, %v1371_v30, -inf }
 0x8a8   :  { %1374 = vmax.xlane.f32.xlu1 %v1373_v15 }
 0x8bf   :  { %v1360_v5 = vpop.permute.xlu0 %1359 }
 0x8c0   :  { %v1364_v28 = vadd.f32 %v1362_v21, %v1360_v5 }
 0x8c2   :  { %vm1366_vm9 = vcmp.gt.f32.partialorder %v1364_v28, 0.0  ;;  %v1368_v29 = vmul.f32 0.2, %v1364_v28 }
 0x8c4   :  { %v1370_v39 = vsel %vm1366_vm9, %v1364_v28, %v1368_v29 }
 0x8c5   :  { %v1372_v34 = vadd.f32 %v1708_v31, %v1370_v39 }
 0x8c7   :  { %v1376_v14 = vsel %vm222_vm3, %v1372_v34, -inf }
 0x8c8   :  { %1377 = vmax.xlane.f32.xlu1 %v1376_v14 }
 0x8ea   :  { %v798_v9 = vpop.xlane.xlu0 %797 }
 0x8eb   :  { %v802_v55 = vsub.f32 %v2231_v8, %v798_v9 }
 0x8ed   :  { %v804_v60 = vmul.f32 1.442695, %v802_v55 }
 0x91b   :  { %v1375_v32 = vpop.xlane.xlu1 %1374 }
 0x91c   :  { %v1379_v16 = vsub.f32 %v1371_v30, %v1375_v32 }
 0x91e   :  { %v1381_v40 = vmul.f32 1.442695, %v1379_v16 }
 0x920   :  { %1677 = vpow2.f32 %v1381_v40 }
 0x921   :  { %1679 = vpow2.f32 %v790_v44 }
 0x926   :  { %v1678_v51 = vpop.eup %1677 }
 0x927   :  { %v1385_v42 = vsel %vm222_vm3, %v1678_v51, 0.0  ;;  %v1680_v57 = vpop.eup %1679 }
 0x928   :  { %1386 = vadd.xlane.f32.xlu2 %v1385_v42  ;;  %v1516_v50 = vadd.f32 -1.0, %v1680_v57 }
 0x92a   :  { %v795_v52 = vsel %vm787_vm10, %v2223_v41, %v1516_v50 }
 0x92b   :  { %v799_v53 = vsel %vm222_vm3, %v795_v52, -inf }
 0x93b   :  { %v1378_v46 = vpop.xlane.xlu1 %1377 }
 0x93c   :  { %v1380_v47 = vsub.f32 %v1372_v34, %v1378_v46 }
 0x93e   :  { %v1383_v38 = vmul.f32 1.442695, %v1380_v47 }
 0x940   :  { %1681 = vpow2.f32 %v1383_v38 }
 0x946   :  { %v1682_v48 = vpop.eup %1681 }
 0x947   :  { %v1388_v59 = vsel %vm222_vm3, %v1682_v48, 0.0 }
 0x948   :  { %1389 = vadd.xlane.f32.xlu1 %v1388_v59 }
 0x950   :  { %800 = vmax.xlane.f32.xlu1 %v799_v53 }
 0x99b   :  { %v1387_v26 = vpop.xlane.xlu2 %1386 }
 0x99c   :  { %1683 = vrcp.f32 %v1387_v26 }
 0x9a2   :  { %v1684_v27 = vpop.eup %1683 }
 0x9a3   :  { %v1393_v56 = vmul.f32 %v1684_v27, %v1678_v51 }
 0x9a5   :  { %1538 = vmatmul.msk.f32.vlgmr.msra.gmra.mxu3 %vm222_vm3, %v1393_v56 }
 0x9bb   :  { %v1390_v54 = vpop.xlane.xlu1 %1389 }
 0x9bc   :  { %1685 = vrcp.f32 %v1390_v54 }
 0x9c2   :  { %v1686_v63 = vpop.eup %1685 }
 0x9c3   :  { %v801_v36 = vpop.xlane.xlu1 %800  ;;  %v1394_v43 = vmul.f32 %v1686_v63, %v1682_v48 }
 0x9c4   :  { %v803_v0 = vsub.f32 %v795_v52, %v801_v36 }
 0x9c5   :  { %1539 = vmatmul.msk.f32.gmra.mxu3 %vm222_vm3, %v1394_v43 }
 0x9c6   :  { %v806_v1 = vmul.f32 1.442695, %v803_v0 }
 0x9c8   :  { %1687 = vpow2.f32 %v806_v1 }
 0x9ce   :  { %v1688_v45 = vpop.eup %1687 }
 0x9cf   :  { %v811_v2 = vsel %vm222_vm3, %v1688_v45, 0.0 }
 0x9d0   :  { %812 = vadd.xlane.f32.xlu2 %v811_v2 }
 0xa28   :  { %v1418_v25 = vpop.f32.mrf.mxu3 }
 0xa29   :  { %v1426_v33 = vmul.f32 1.442695, %v1418_v25  ;;  %vm1424_vm11 = vcmp.gt.f32.partialorder %v1418_v25, 0.0 }
 0xa2b   :  { %1689 = vpow2.f32 %v1426_v33 }
 0xa31   :  { %v1690_v41 = vpop.eup %1689 }
 0xa32   :  { %v1540_v4 = vadd.f32 -1.0, %v1690_v41 }
 0xa34   :  { %v1432_v6 = vsel %vm1424_vm11, %v1418_v25, %v1540_v4 }
 0xa35   :  { %v1434_v17 = vsel %vm222_vm3, %v1432_v6, -inf }
 0xa36   :  { %1435 = vmax.xlane.f32.xlu1 %v1434_v17 }
 0xa43   :  { %v813_v18 = vpop.xlane.xlu2 %812 }
 0xa44   :  { %1691 = vlog2.f32 %v813_v18 }
 0xa48   :  { %v1421_v7 = vpop.f32.mrf.mxu3 }
 0xa49   :  { %v1428_v35 = vmul.f32 1.442695, %v1421_v7  ;;  %vm1425_vm12 = vcmp.gt.f32.partialorder %v1421_v7, 0.0 }
 0xa4a   :  { %v1692_v62 = vpop.eup %1691 }
 0xa4b   :  { %v817_v10 = vmul.f32 0.6931472, %v1692_v62  ;;  %1693 = vpow2.f32 %v1428_v35 }
 0xa4c   :  { %1695 = vpow2.f32 %v804_v60 }
 0xa4d   :  { %v819_v12 = vsub.f32 %v803_v0, %v817_v10 }
 0xa4f   :  { %821 = vst.msk [vmem:[#allocation2 + $0x8] sm:$0xff] %vm222_vm3, %v819_v12 }
 0xa51   :  { %v1694_v23 = vpop.eup %1693 }
 0xa52   :  { %v1541_v13 = vadd.f32 -1.0, %v1694_v23  ;;  %v1696_v20 = vpop.eup %1695 }
 0xa53   :  { %v808_v49 = vsel %vm222_vm3, %v1696_v20, 0.0 }
 0xa54   :  { %v1433_v3 = vsel %vm1425_vm12, %v1421_v7, %v1541_v13 }
 0xa55   :  { %v1437_v19 = vsel %vm222_vm3, %v1433_v3, -inf }
 0xa56   :  { %1438 = vmax.xlane.f32.xlu1 %v1437_v19 }
 0xa5e   :  { %809 = vadd.xlane.f32.xlu1 %v808_v49 }
 0xaa9   :  { %v1436_v58 = vpop.xlane.xlu1 %1435 }
 0xaaa   :  { %v1440_v21 = vsub.f32 %v1432_v6, %v1436_v58 }
 0xaac   :  { %v1442_v11 = vmul.f32 1.442695, %v1440_v21 }
 0xaae   :  { %1697 = vpow2.f32 %v1442_v11 }
 0xab4   :  { %v1698_v8 = vpop.eup %1697 }
 0xab5   :  { %v1446_v22 = vsel %vm222_vm3, %v1698_v8, 0.0 }
 0xab6   :  { %1447 = vadd.xlane.f32.xlu1 %v1446_v22 }
 0xac9   :  { %v1439_v37 = vpop.xlane.xlu1 %1438 }
 0xaca   :  { %v1441_v61 = vsub.f32 %v1433_v3, %v1439_v37 }
 0xacc   :  { %v1444_v24 = vmul.f32 1.442695, %v1441_v61 }
 0xace   :  { %1699 = vpow2.f32 %v1444_v24 }
 0xad1   :  { %v810_v30 = vpop.xlane.xlu1 %809 }
 0xad2   :  { %1701 = vlog2.f32 %v810_v30 }
 0xad4   :  { %v1700_v15 = vpop.eup %1699 }
 0xad5   :  { %v1449_v5 = vsel %vm222_vm3, %v1700_v15, 0.0 }
 0xad6   :  { %1450 = vadd.xlane.f32.xlu0 %v1449_v5 }
 0xad8   :  { %v1702_v28 = vpop.eup %1701 }
 0xad9   :  { %v815_v29 = vmul.f32 0.6931472, %v1702_v28 }
 0xadb   :  { %v818_v39 = vsub.f32 %v802_v55, %v815_v29 }
 0xadd   :  { %820 = vst.msk [vmem:[#allocation2] sm:$0xff] %vm222_vm3, %v818_v39 }
 0xb29   :  { %v1448_v31 = vpop.xlane.xlu1 %1447 }
 0xb2a   :  { %1703 = vlog2.f32 %v1448_v31 }
 0xb30   :  { %v1704_v34 = vpop.eup %1703 }
 0xb31   :  { %v1453_v14 = vmul.f32 0.6931472, %v1704_v34 }
 0xb33   :  { %v1456_v32 = vsub.f32 %v1440_v21, %v1453_v14 }
 0xb35   :  { %1459 = vst.msk [vmem:[#allocation2 + $0x10] sm:$0xff] %vm222_vm3, %v1456_v32 }
 0xb49   :  { %v1451_v16 = vpop.xlane.xlu0 %1450 }
 0xb4a   :  { %1705 = vlog2.f32 %v1451_v16 }
 0xb50   :  { %v1706_v40 = vpop.eup %1705 }
 0xb51   :  { %v1455_v51 = vmul.f32 0.6931472, %v1706_v40 }
 0xb53   :  { %v1457_v42 = vsub.f32 %v1441_v61, %v1455_v51 }
 0xb55   :  { %1460 = vst.msk [vmem:[#allocation2 + $0x18] sm:$0xff] %vm222_vm3, %v1457_v42 }
 0xb56   :  { %1473 = dma.vmem_to_hbm [thread:$0]  %s1466_s22, 512, %s1468_s24, [#allocation3], %s1744_s25, %s1744_s25, %s1745_s26  }
 0xb57   :  { %1733 = dma.done.wait [#allocation3], 512  }
 0xb58   :  { %1734 = vsyncadd [#allocation3], 4294966784 }
 0xb59   :  { %1478 = vsyncpa [#allocation3], 1 }

</bundles_post_ra>
